<compile_context>
chip_gen: v5e
topology: v5e:2x2
jax: 0.10.0
libtpu: 0.0.40
codegen_flags: <defaults>
</compile_context>

<pallas_src>
import jax
import jax.numpy as jnp
from jax import lax
from jax.experimental import pallas as pl
from jax.experimental.pallas import tpu as pltpu


# --------------------------------------------------------------------------
# Kernel: one (batch, query-tile, key-tile) grid step of the non-local block.
# --------------------------------------------------------------------------
def _nl_flash_kernel(kq_ref, k_ref, v_ref, xq_ref, ww_ref, bw_ref,
                     out_ref, m_sc, l_sc, acc_sc):
    """
    kq_ref : (1, Ck, Tq) bf16  query tile (= precomputed key cols at q)
    k_ref  : (1, Ck, Tk) bf16  key tile
    v_ref  : (1, Cv, Tk) bf16  value tile
    xq_ref : (1, C,  Tq) f32   raw x cols at q (residual)
    ww_ref : (C, Cv)     f32   W 1x1 conv weight
    bw_ref : (C, 1)      f32   W bias
    out_ref: (1, C,  Tq) f32   result tile (x + W(context)), lane-dense in Tq
    m_sc   : (1, Tq)     f32   running row max      (online softmax)
    l_sc   : (1, Tq)     f32   running denominator  (online softmax)
    acc_sc : (Cv, Tq)    f32   running context accumulator
    """
    k_idx = pl.program_id(2)

    @pl.when(k_idx == 0)
    def _init():
        m_sc[...] = jnp.full_like(m_sc, -jnp.inf)
        l_sc[...] = jnp.zeros_like(l_sc)
        acc_sc[...] = jnp.zeros_like(acc_sc)

    q = kq_ref[0]                                     # (Ck, Tq) bf16, resident over k
    key = k_ref[0]                                    # (Ck, Tk) bf16
    val = v_ref[0]                                    # (Cv, Tk) bf16

    # s (Tk, Tq): contract Ck on the MXU; lane axis = Tq (lane-dense state).
    s = lax.dot_general(key, q, (((0,), (0,)), ((), ())),
                        preferred_element_type=jnp.float32)

    # Online softmax update over the key axis (axis 0 of s).
    m_prev = m_sc[...]                                # (1, Tq)
    m_new = jnp.maximum(m_prev, jnp.max(s, axis=0, keepdims=True))
    alpha = jnp.exp(m_prev - m_new)                   # (1, Tq)
    p = jnp.exp(s - m_new)                            # (Tk, Tq) f32
    l_sc[...] = alpha * l_sc[...] + jnp.sum(p, axis=0, keepdims=True)
    # acc (Cv, Tq) += V @ p, bf16 MXU inputs, f32 accumulation.
    acc_sc[...] = alpha * acc_sc[...] + jnp.dot(
        val, p.astype(jnp.bfloat16), preferred_element_type=jnp.float32)
    m_sc[...] = m_new

    @pl.when(k_idx == pl.num_programs(2) - 1)
    def _finalize():
        ctx = acc_sc[...] * pl.reciprocal(l_sc[...], approx=True)   # (Cv, Tq)
        o = jnp.dot(ww_ref[...], ctx, preferred_element_type=jnp.float32)  # (C, Tq)
        out_ref[0] = o + bw_ref[...] + xq_ref[0]


# --------------------------------------------------------------------------
# Tiling / VMEM heuristics.
# --------------------------------------------------------------------------
def _physical_vmem_bytes():
    try:
        return int(pltpu.get_tpu_info().vmem_capacity_bytes)
    except Exception:
        return 64 * 2 ** 20          # conservative default (v7x per-core VMEM)


def _largest_div_tile(hw, cap):
    """Largest multiple-of-128 divisor of hw that is <= cap (None if none)."""
    best = None
    t = 128
    limit = min(hw, cap)
    while t <= limit:
        if hw % t == 0:
            best = t
        t += 128
    return best


def _choose_tiles(HW, B, vmem_bytes):
    big_vmem = vmem_bytes >= 100 * 2 ** 20   # v5e/v6e (128 MiB) vs v7x (64 MiB)
    # Small-HW fast path: the (s, p) temporaries (2*HW^2*4 B) fit comfortably,
    # so run one (q, k) step per batch and skip the multi-step rescale work.
    if 2 * HW * HW * 4 <= (16 if big_vmem else 8) * 2 ** 20 and B >= 2:
        return HW, HW
    tq_cap = 4096 if big_vmem else 2048      # Tq is the HBM-traffic knob
    tk_cap = 512
    if B == 1:
        # Keep >= 2 parallel grid steps so both v7x TensorCores get work.
        tq_cap = min(tq_cap, max(128, HW // 2))
    tq = _largest_div_tile(HW, tq_cap)
    tk = _largest_div_tile(HW, tk_cap)
    if tq is None or tk is None:
        # TODO(synk): masked ragged-tile path; for now fall back to full-extent
        # blocks when HW is not a multiple of 128 (VMEM then scales as HW^2).
        return HW, HW
    return tq, tk


def _stream_spec(block, index_map, n_k):
    """K/V streamed tiles: 3-deep buffering when the k axis is long (v5e win)."""
    if n_k >= 3:
        try:
            return pl.BlockSpec(block, index_map, pipeline_mode=pl.Buffered(3))
        except TypeError:
            pass
    return pl.BlockSpec(block, index_map)


# --------------------------------------------------------------------------
# Wrapper.
# --------------------------------------------------------------------------
def nonlocal_ca_forward(x, params, *, tile_q=None, tile_k=None):
    """x: (B, C, H, W) float32 NCHW. Returns same shape (Nonlocal_CA forward)."""
    B, C, H, W = x.shape
    HW = H * W
    Ck = params["wk"].shape[0]
    Cv = params["wv"].shape[0]

    x3 = x.reshape(B, C, HW).astype(jnp.float32)

    # ---- prologue: fused K/V projection over the full HW (one well-shaped
    # (Ck+Cv, C) x (C, HW) matmul), stored in HBM as bf16 so the flash loop
    # streams half the bytes.  f_query shares f_key, so query == K.
    wkv = jnp.concatenate([params["wk"], params["wv"]], axis=0)     # (Ck+Cv, C)
    bkv = jnp.concatenate([params["bk"], params["bv"]], axis=0)     # (Ck+Cv, 1)
    kv = jnp.einsum("oc,bcn->bon", wkv, x3) + bkv[None]             # (B, Ck+Cv, HW)
    kmat = kv[:, :Ck, :].astype(jnp.bfloat16)                       # (B, Ck, HW)
    vmat = kv[:, Ck:, :].astype(jnp.bfloat16)                       # (B, Cv, HW)

    # ---- tiling + VMEM budget (generation-aware).
    vmem_phys = _physical_vmem_bytes()
    auto_tq, auto_tk = _choose_tiles(HW, B, vmem_phys)
    Tq = tile_q if tile_q is not None else auto_tq
    Tk = tile_k if tile_k is not None else auto_tk
    assert HW % Tq == 0 and HW % Tk == 0, "tile must divide H*W"
    n_q, n_k = HW // Tq, HW // Tk

    nbuf = 3 if n_k >= 3 else 2
    est = (
        2 * 4 * C * Tq                      # out tile (double-buffered)
        + 2 * 4 * C * Tq                    # x residual tile
        + 2 * 2 * Ck * Tq                   # query tile (bf16)
        + nbuf * 2 * Ck * Tk                # streamed key tiles (bf16)
        + nbuf * 2 * Cv * Tk                # streamed value tiles (bf16)
        + 2 * 4 * (C * Cv + C)              # W weight + bias
        + 4 * (2 * Tq + Cv * Tq)            # m, l, acc scratch
        + 4 * 2 * Tq * Tk + 2 * Tq * Tk     # s, p (f32) + p bf16 temporaries
        + 4 * (Cv * Tq + C * Tq)            # ctx + o temporaries
    )
    limit_cap = (96 if vmem_phys >= 100 * 2 ** 20 else 48) * 2 ** 20
    vmem_limit = int(min(max(int(1.5 * est) + (8 << 20), 32 << 20), limit_cap))

    out3 = pl.pallas_call(
        _nl_flash_kernel,
        out_shape=jax.ShapeDtypeStruct((B, C, HW), jnp.float32),
        grid_spec=pltpu.PrefetchScalarGridSpec(
            num_scalar_prefetch=0,
            grid=(B, n_q, n_k),                                     # reduction (k) last
            in_specs=[
                pl.BlockSpec((1, Ck, Tq), lambda b, q, k: (b, 0, q)),   # query tile (K cols)
                _stream_spec((1, Ck, Tk), lambda b, q, k: (b, 0, k), n_k),  # key tile
                _stream_spec((1, Cv, Tk), lambda b, q, k: (b, 0, k), n_k),  # value tile
                pl.BlockSpec((1, C, Tq), lambda b, q, k: (b, 0, q)),    # x residual cols
                pl.BlockSpec((C, Cv), lambda b, q, k: (0, 0)),          # W weight
                pl.BlockSpec((C, 1), lambda b, q, k: (0, 0)),           # W bias
            ],
            out_specs=pl.BlockSpec((1, C, Tq), lambda b, q, k: (b, 0, q)),
            scratch_shapes=[
                pltpu.VMEM((1, Tq), jnp.float32),    # running max
                pltpu.VMEM((1, Tq), jnp.float32),    # running denominator
                pltpu.VMEM((Cv, Tq), jnp.float32),   # running context accumulator
            ],
        ),
        compiler_params=pltpu.CompilerParams(
            dimension_semantics=("parallel", "parallel", "arbitrary"),
            vmem_limit_bytes=vmem_limit),
    )(kmat, kmat, vmat, x3, params["ww"], params["bw"])

    return out3.reshape(B, C, H, W)


# --------------------------------------------------------------------------
# Pure-JAX reference matching the PyTorch Nl / Nonlocal_CA semantics.
# --------------------------------------------------------------------------
def reference_forward(x, params):
    B, C, H, W = x.shape
    xr = x.reshape(B, C, H * W).astype(jnp.float32)
    key = jnp.einsum("kc,bcn->bkn", params["wk"], xr) + params["bk"][None]    # (B, Ck, HW)
    query = key                                                               # f_query = f_key
    value = jnp.einsum("vc,bcn->bvn", params["wv"], xr) + params["bv"][None]  # (B, Cv, HW)
    sim = jnp.einsum("bkq,bkn->bqn", query, key)                              # (B, HW, HW)
    attn = jax.nn.softmax(sim, axis=-1)
    ctx = jnp.einsum("bqn,bvn->bqv", attn, value)                             # (B, HW, Cv)
    out = jnp.einsum("cv,bqv->bcq", params["ww"], ctx) + params["bw"][None] + xr
    return out.reshape(B, C, H, W)


def init_params(key, in_feat, inter_feat):
    ks = jax.random.split(key, 6)
    s = 0.1
    return {
        # f_key (= f_query): Conv2d(in_feat, inter_feat, 1)
        "wk": s * jax.random.normal(ks[0], (inter_feat, in_feat), jnp.float32),
        "bk": s * jax.random.normal(ks[1], (inter_feat, 1), jnp.float32),
        # f_value: Conv2d(in_feat, inter_feat, 1)
        "wv": s * jax.random.normal(ks[2], (inter_feat, in_feat), jnp.float32),
        "bv": s * jax.random.normal(ks[3], (inter_feat, 1), jnp.float32),
        # W: Conv2d(inter_feat, in_feat, 1).  PyTorch inits W to zero (output
        # == x); we use small random values so the full path is exercised.
        "ww": s * jax.random.normal(ks[4], (in_feat, inter_feat), jnp.float32),
        "bw": s * jax.random.normal(ks[5], (in_feat, 1), jnp.float32),
    }


if __name__ == "__main__":
    # Nonlocal_CA defaults: in_feat=64, inter_feat=16; small spatial map.
    B, C, H, W = 2, 64, 16, 16
    inter = 16

    key = jax.random.PRNGKey(0)
    kx, kp = jax.random.split(key)
    x = jax.random.normal(kx, (B, C, H, W), jnp.float32)
    params = init_params(kp, C, inter)

    ref = reference_forward(x, params)

    # Default tiling: small-HW fast path -> grid (B, 1, 1), one pass per image.
    out = jax.block_until_ready(nonlocal_ca_forward(x, params))
    assert out.shape == (B, C, H, W)
    err = float(jnp.max(jnp.abs(out - ref)))
    # bf16 K/V/p + approx reciprocal -> loosened tolerance vs the f32 reference.
    assert jnp.allclose(out, ref, rtol=3e-2, atol=3e-2), f"fast-path max err = {err}"

    # Forced smaller tiles: grid (2, 2, 2) exercises the multi-key-tile online
    # softmax accumulation across k steps.
    out2 = jax.block_until_ready(nonlocal_ca_forward(x, params, tile_q=128, tile_k=128))
    err2 = float(jnp.max(jnp.abs(out2 - ref)))
    assert jnp.allclose(out2, ref, rtol=3e-2, atol=3e-2), f"tiled-path max err = {err2}"

    print("KERNEL_OK")
</pallas_src>

<mosaic_0001>
module attributes {stable_mosaic.version = 11 : i64} {
  func.func @_nl_flash_kernel(%arg0: i32, %arg1: i32, %arg2: i32, %arg3: memref<1x16x256xbf16, #tpu.memory_space<vmem>>, %arg4: memref<1x16x256xbf16, #tpu.memory_space<vmem>>, %arg5: memref<1x16x256xbf16, #tpu.memory_space<vmem>>, %arg6: memref<1x64x256xf32, #tpu.memory_space<vmem>>, %arg7: memref<64x16xf32, #tpu.memory_space<vmem>>, %arg8: memref<64x1xf32, #tpu.memory_space<vmem>>, %arg9: memref<1x64x256xf32, #tpu.memory_space<vmem>>, %arg10: memref<1x256xf32, #tpu.memory_space<vmem>>, %arg11: memref<1x256xf32, #tpu.memory_space<vmem>>, %arg12: memref<16x256xf32, #tpu.memory_space<vmem>>) attributes {dimension_semantics = [#tpu.dimension_semantics<parallel>, #tpu.dimension_semantics<parallel>, #tpu.dimension_semantics<arbitrary>], iteration_bounds = array<i64: 2, 1, 1>, scalar_prefetch = 0 : i64, scratch_operands = 3 : i64, tpu.core_type = #tpu.core_type<tc>, window_params = [{transform_indices = @transform_0, window_bounds = array<i64: 1, 16, 256>}, {transform_indices = @transform_1, window_bounds = array<i64: 1, 16, 256>}, {transform_indices = @transform_2, window_bounds = array<i64: 1, 16, 256>}, {transform_indices = @transform_3, window_bounds = array<i64: 1, 64, 256>}, {pipeline_mode = #tpu.pipeline_mode<synchronous>, transform_indices = @transform_4, window_bounds = array<i64: 64, 16>}, {pipeline_mode = #tpu.pipeline_mode<synchronous>, transform_indices = @transform_5, window_bounds = array<i64: 64, 1>}, {transform_indices = @transform_6, window_bounds = array<i64: 1, 64, 256>}]} {
    %c0_i32 = arith.constant 0 : i32
    %0 = arith.cmpi eq, %arg2, %c0_i32 : i32
    %1 = arith.extui %0 : i1 to i32
    %c0_i32_0 = arith.constant 0 : i32
    %2 = arith.cmpi ne, %1, %c0_i32_0 : i32
    scf.if %2 {
      %cst_26 = arith.constant 0xFF800000 : f32
      %36 = vector.broadcast %cst_26 : f32 to vector<1x256xf32>
      %c0_27 = arith.constant 0 : index
      %c0_28 = arith.constant 0 : index
      %37 = vector.load %arg10[%c0_27, %c0_28] : memref<1x256xf32, #tpu.memory_space<vmem>>, vector<1x256xf32>
      tpu.vector_store %arg10[%c0_27, %c0_28], %36 {strides = array<i32>} : memref<1x256xf32, #tpu.memory_space<vmem>>, vector<1x256xf32>,
      %cst_29 = arith.constant 0.000000e+00 : f32
      %38 = vector.broadcast %cst_29 : f32 to vector<1x256xf32>
      %c0_30 = arith.constant 0 : index
      %c0_31 = arith.constant 0 : index
      %39 = vector.load %arg11[%c0_30, %c0_31] : memref<1x256xf32, #tpu.memory_space<vmem>>, vector<1x256xf32>
      tpu.vector_store %arg11[%c0_30, %c0_31], %38 {strides = array<i32>} : memref<1x256xf32, #tpu.memory_space<vmem>>, vector<1x256xf32>,
      %cst_32 = arith.constant 0.000000e+00 : f32
      %40 = vector.broadcast %cst_32 : f32 to vector<16x256xf32>
      %c0_33 = arith.constant 0 : index
      %c0_34 = arith.constant 0 : index
      %41 = vector.load %arg12[%c0_33, %c0_34] : memref<16x256xf32, #tpu.memory_space<vmem>>, vector<16x256xf32>
      tpu.vector_store %arg12[%c0_33, %c0_34], %40 {strides = array<i32>} : memref<16x256xf32, #tpu.memory_space<vmem>>, vector<16x256xf32>,
    } else {
    }
    %c0 = arith.constant 0 : index
    %c0_1 = arith.constant 0 : index
    %c0_2 = arith.constant 0 : index
    %3 = vector.load %arg3[%c0, %c0_1, %c0_2] : memref<1x16x256xbf16, #tpu.memory_space<vmem>>, vector<1x16x256xbf16>
    %4 = vector.shape_cast %3 : vector<1x16x256xbf16> to vector<16x256xbf16>
    %c0_3 = arith.constant 0 : index
    %c0_4 = arith.constant 0 : index
    %c0_5 = arith.constant 0 : index
    %5 = vector.load %arg4[%c0_3, %c0_4, %c0_5] : memref<1x16x256xbf16, #tpu.memory_space<vmem>>, vector<1x16x256xbf16>
    %6 = vector.shape_cast %5 : vector<1x16x256xbf16> to vector<16x256xbf16>
    %c0_6 = arith.constant 0 : index
    %c0_7 = arith.constant 0 : index
    %c0_8 = arith.constant 0 : index
    %7 = vector.load %arg5[%c0_6, %c0_7, %c0_8] : memref<1x16x256xbf16, #tpu.memory_space<vmem>>, vector<1x16x256xbf16>
    %8 = vector.shape_cast %7 : vector<1x16x256xbf16> to vector<16x256xbf16>
    %cst = arith.constant dense<0.000000e+00> : vector<256x256xf32>
    %9 = tpu.matmul %6, %4, %cst {dimension_numbers = #tpu.dot_dimension_numbers<[0], [0], [1], [1], [0, 1, 1, 1], [], []>} : vector<16x256xbf16>, vector<16x256xbf16>, vector<256x256xf32> -> vector<256x256xf32>
    %c0_9 = arith.constant 0 : index
    %c0_10 = arith.constant 0 : index
    %10 = vector.load %arg10[%c0_9, %c0_10] : memref<1x256xf32, #tpu.memory_space<vmem>>, vector<1x256xf32>
    %cst_11 = arith.constant dense<0xFF800000> : vector<256xf32>
    %11 = vector.multi_reduction <maximumf>, %9, %cst_11 [0] : vector<256x256xf32> to vector<256xf32>
    %12 = vector.shape_cast %11 : vector<256xf32> to vector<1x256xf32>
    %13 = arith.maximumf %10, %12 : vector<1x256xf32>
    %14 = arith.subf %10, %13 : vector<1x256xf32>
    %15 = math.exp %14 : vector<1x256xf32>
    %16 = vector.broadcast %13 : vector<1x256xf32> to vector<256x256xf32>
    %17 = arith.subf %9, %16 : vector<256x256xf32>
    %18 = math.exp %17 : vector<256x256xf32>
    %c0_12 = arith.constant 0 : index
    %c0_13 = arith.constant 0 : index
    %19 = vector.load %arg11[%c0_12, %c0_13] : memref<1x256xf32, #tpu.memory_space<vmem>>, vector<1x256xf32>
    %20 = arith.mulf %15, %19 : vector<1x256xf32>
    %cst_14 = arith.constant dense<0.000000e+00> : vector<256xf32>
    %21 = vector.multi_reduction <add>, %18, %cst_14 [0] : vector<256x256xf32> to vector<256xf32>
    %22 = vector.shape_cast %21 : vector<256xf32> to vector<1x256xf32>
    %23 = arith.addf %20, %22 : vector<1x256xf32>
    %c0_15 = arith.constant 0 : index
    %c0_16 = arith.constant 0 : index
    %24 = vector.load %arg11[%c0_15, %c0_16] : memref<1x256xf32, #tpu.memory_space<vmem>>, vector<1x256xf32>
    tpu.vector_store %arg11[%c0_15, %c0_16], %23 {strides = array<i32>} : memref<1x256xf32, #tpu.memory_space<vmem>>, vector<1x256xf32>,
    %c0_17 = arith.constant 0 : index
    %c0_18 = arith.constant 0 : index
    %25 = vector.load %arg12[%c0_17, %c0_18] : memref<16x256xf32, #tpu.memory_space<vmem>>, vector<16x256xf32>
    %26 = vector.broadcast %15 : vector<1x256xf32> to vector<16x256xf32>
    %27 = arith.mulf %26, %25 : vector<16x256xf32>
    %28 = arith.truncf %18 : vector<256x256xf32> to vector<256x256xbf16>
    %cst_19 = arith.constant dense<0.000000e+00> : vector<16x256xf32>
    %29 = tpu.matmul %8, %28, %cst_19 {dimension_numbers = #tpu.dot_dimension_numbers<[1], [0], [0], [1], [0, 0, 1, 1], [], []>} : vector<16x256xbf16>, vector<256x256xbf16>, vector<16x256xf32> -> vector<16x256xf32>
    %30 = arith.addf %27, %29 : vector<16x256xf32>
    %c0_20 = arith.constant 0 : index
    %c0_21 = arith.constant 0 : index
    %31 = vector.load %arg12[%c0_20, %c0_21] : memref<16x256xf32, #tpu.memory_space<vmem>>, vector<16x256xf32>
    tpu.vector_store %arg12[%c0_20, %c0_21], %30 {strides = array<i32>} : memref<16x256xf32, #tpu.memory_space<vmem>>, vector<16x256xf32>,
    %c0_22 = arith.constant 0 : index
    %c0_23 = arith.constant 0 : index
    %32 = vector.load %arg10[%c0_22, %c0_23] : memref<1x256xf32, #tpu.memory_space<vmem>>, vector<1x256xf32>
    tpu.vector_store %arg10[%c0_22, %c0_23], %13 {strides = array<i32>} : memref<1x256xf32, #tpu.memory_space<vmem>>, vector<1x256xf32>,
    %c0_i32_24 = arith.constant 0 : i32
    %33 = arith.cmpi eq, %arg2, %c0_i32_24 : i32
    %34 = arith.extui %33 : i1 to i32
    %c0_i32_25 = arith.constant 0 : i32
    %35 = arith.cmpi ne, %34, %c0_i32_25 : i32
    scf.if %35 {
      %c0_26 = arith.constant 0 : index
      %c0_27 = arith.constant 0 : index
      %36 = vector.load %arg12[%c0_26, %c0_27] : memref<16x256xf32, #tpu.memory_space<vmem>>, vector<16x256xf32>
      %c0_28 = arith.constant 0 : index
      %c0_29 = arith.constant 0 : index
      %37 = vector.load %arg11[%c0_28, %c0_29] : memref<1x256xf32, #tpu.memory_space<vmem>>, vector<1x256xf32>
      %38 = tpu.reciprocal %37 {approx = true} : vector<1x256xf32> -> vector<1x256xf32>
      %39 = vector.broadcast %38 : vector<1x256xf32> to vector<16x256xf32>
      %40 = arith.mulf %36, %39 : vector<16x256xf32>
      %c0_30 = arith.constant 0 : index
      %c0_31 = arith.constant 0 : index
      %41 = vector.load %arg7[%c0_30, %c0_31] : memref<64x16xf32, #tpu.memory_space<vmem>>, vector<64x16xf32>
      %cst_32 = arith.constant dense<0.000000e+00> : vector<64x256xf32>
      %42 = tpu.matmul %41, %40, %cst_32 {dimension_numbers = #tpu.dot_dimension_numbers<[1], [0], [0], [1], [0, 0, 1, 1], [], []>} : vector<64x16xf32>, vector<16x256xf32>, vector<64x256xf32> -> vector<64x256xf32>
      %c0_33 = arith.constant 0 : index
      %c0_34 = arith.constant 0 : index
      %43 = vector.load %arg8[%c0_33, %c0_34] : memref<64x1xf32, #tpu.memory_space<vmem>>, vector<64x1xf32>
      %44 = vector.broadcast %43 : vector<64x1xf32> to vector<64x256xf32>
      %45 = arith.addf %42, %44 : vector<64x256xf32>
      %c0_35 = arith.constant 0 : index
      %c0_36 = arith.constant 0 : index
      %c0_37 = arith.constant 0 : index
      %46 = vector.load %arg6[%c0_35, %c0_36, %c0_37] : memref<1x64x256xf32, #tpu.memory_space<vmem>>, vector<1x64x256xf32>
      %47 = vector.shape_cast %46 : vector<1x64x256xf32> to vector<64x256xf32>
      %48 = arith.addf %45, %47 : vector<64x256xf32>
      %c0_38 = arith.constant 0 : index
      %c0_39 = arith.constant 0 : index
      %c0_40 = arith.constant 0 : index
      %49 = vector.load %arg9[%c0_38, %c0_39, %c0_40] : memref<1x64x256xf32, #tpu.memory_space<vmem>>, vector<1x64x256xf32>
      %50 = vector.shape_cast %49 : vector<1x64x256xf32> to vector<64x256xf32>
      %51 = vector.shape_cast %48 : vector<64x256xf32> to vector<1x64x256xf32>
      tpu.vector_store %arg9[%c0_38, %c0_39, %c0_40], %51 {strides = array<i32>} : memref<1x64x256xf32, #tpu.memory_space<vmem>>, vector<1x64x256xf32>,
    } else {
    }
    return
  }
  func.func @transform_0(%arg0: i32, %arg1: i32, %arg2: i32) -> (i32, i32, i32) {
    %c0_i32 = arith.constant 0 : i32
    %c0_i32_0 = arith.constant 0 : i32
    return %arg0, %c0_i32, %arg1 : i32, i32, i32
  }
  func.func @transform_1(%arg0: i32, %arg1: i32, %arg2: i32) -> (i32, i32, i32) {
    %c0_i32 = arith.constant 0 : i32
    %c0_i32_0 = arith.constant 0 : i32
    return %arg0, %c0_i32, %arg2 : i32, i32, i32
  }
  func.func @transform_2(%arg0: i32, %arg1: i32, %arg2: i32) -> (i32, i32, i32) {
    %c0_i32 = arith.constant 0 : i32
    %c0_i32_0 = arith.constant 0 : i32
    return %arg0, %c0_i32, %arg2 : i32, i32, i32
  }
  func.func @transform_3(%arg0: i32, %arg1: i32, %arg2: i32) -> (i32, i32, i32) {
    %c0_i32 = arith.constant 0 : i32
    %c0_i32_0 = arith.constant 0 : i32
    return %arg0, %c0_i32, %arg1 : i32, i32, i32
  }
  func.func @transform_4(%arg0: i32, %arg1: i32, %arg2: i32) -> (i32, i32) {
    %c0_i32 = arith.constant 0 : i32
    %c0_i32_0 = arith.constant 0 : i32
    %c0_i32_1 = arith.constant 0 : i32
    return %c0_i32, %c0_i32_0 : i32, i32
  }
  func.func @transform_5(%arg0: i32, %arg1: i32, %arg2: i32) -> (i32, i32) {
    %c0_i32 = arith.constant 0 : i32
    %c0_i32_0 = arith.constant 0 : i32
    %c0_i32_1 = arith.constant 0 : i32
    return %c0_i32, %c0_i32_0 : i32, i32
  }
  func.func @transform_6(%arg0: i32, %arg1: i32, %arg2: i32) -> (i32, i32, i32) {
    %c0_i32 = arith.constant 0 : i32
    %c0_i32_0 = arith.constant 0 : i32
    return %arg0, %c0_i32, %arg1 : i32, i32, i32
  }
}

</mosaic_0001>

<bundles_post_ra>
// kernel: tpu_custom_call.1
= control target key start
LH: loop header
LB: loop body
LE: loop exit
PB: predicated region body
PF: predicated region fallthrough
CT: control target
= control target key end

     0   :  { %11 = vsyncpa [#allocation6], 0  ;;  %s2917_s0 = inlined_call_operand.vmem [shape: bf16[2,16,256], index: 0, kind: input, shape index: {}]   ;;  %s2918_s1 = inlined_call_operand.vmem [shape: bf16[2,16,256], index: 1, kind: input, shape index: {}]   ;;  %s2919_s2 = inlined_call_operand.vmem [shape: bf16[2,16,256], index: 2, kind: input, shape index: {}]   ;;  %s2920_s3 = inlined_call_operand.hbm [shape: f32[2,64,256], index: 3, kind: input, shape index: {}]   ;;  %s2921_s4 = inlined_call_operand.vmem [shape: f32[64,16], index: 4, kind: input, shape index: {}]   ;;  %s2922_s5 = inlined_call_operand.vmem [shape: f32[64,1], index: 5, kind: input, shape index: {}]   ;;  %s2923_s6 = inlined_call_operand.hbm [shape: f32[2,64,256], index: 6, kind: output, shape index: {}]  }
   0x1   :  { %13 = vsyncpa [#allocation6 + $0x1], 0 }
   0x2   :  { %14 = vsyncpa [#allocation7], 0 }
   0x3   :  { %16 = vsyncpa [#allocation7 + $0x1], 0  ;;  %s2044_s21 = smov 0   ;;  %s2046_s22 = smov 0  }
   0x4   :  { %s2048_s23 = smov 0   ;;  %s2050_s24 = smov 0  }
   0x5   :  { %s2052_s25 = smov 0   ;;  %s2054_s26 = smov 0  }
   0x6 LB: > { %s1578_s27 = sadd.s32 4294967295, %s2000_s26   ;;  %s1579_s28 = sadd.s32 4294967294, %s2000_s26   ;;  %s2000_s26 = sphi %s2054_s26, %s22_s26   ;;  %s1996_s25 = sphi %s2052_s25, %s3016_s25   ;;  %s1992_s24 = sphi %s2050_s24, %s3015_s24   ;;  %s1988_s23 = sphi %s2048_s23, %s3014_s23   ;;  %s1984_s22 = sphi %s2046_s22, %s3013_s22   ;;  %s1980_s21 = sphi %s2044_s21, %s3012_s21  }
   0x7   : > { %s41_s29 = sadd.s32 1, %s1996_s25  ;;  %s134_s30 = sadd.s32 1, %s1988_s23 }
   0x8   : > { %p43_p0 = scmp.ge.s32.totalorder %s41_s29, 2  ;;  %p141_p1 = scmp.ne.s32.totalorder %s1988_s23, %s1984_s22 }
   0x9   : > { %p142_p2 = scmp.eq.s32.totalorder %s2000_s26, 0  ;;  %p147_p3 = scmp.ne.s32.totalorder %s1984_s22, %s1980_s21 }
   0xa   : > { %s3018_s29 = smov (%p43_p0, %s41_s29), 0  ;;  %p148_p5 = scmp.eq.s32.totalorder %s1578_s27, 0 }
   0xb   : > { %2951 = sst [smem:[#allocation11_spill]] %s3018_s29  ;;  %p2085_p4 = por %p142_p2, %p141_p1 }
   0xc   : > { %s129_s8 = ssub.s32 %s1996_s25, %s3018_s29  ;;  %p215_p6 = scmp.eq.s32.totalorder %s1578_s27, 1 }
   0xd   : > { %p132_p7 = scmp.eq.s32.totalorder %s129_s8, 0  ;;  %p2091_p8 = por %p148_p5, %p147_p3 }
   0xe   : > { %p2095_p9 = por %p215_p6, %p141_p1  ;;  %p221_p10 = scmp.eq.s32.totalorder %s1579_s28, 1 }
   0xf   : > { %s2100_s11 = scalar_select %p132_p7, %s1988_s23, %s134_s30  }
  0x10   : > { %p2102_p11 = por %p221_p10, %p147_p3  ;;  %p1581_p12 = scmp.ge.s32.totalorder %s2000_s26, 2 }
  0x11   : > { %p1696_p13 = scmp.lt.s32.totalorder %s2000_s26, 2  ;;  %s286_s13 = sand.u32 1, %s1988_s23  }
  0x12   : > { %s1582_s14 = sshll.u32 %s286_s13, 7  ;;  %s1671_s15 = sshll.u32 %s1996_s25, 7 }
  0x13   : > { %s297_s18 = scalar_lea.hbm %s2920_s3, %s1671_s15  ;;  %s290_s19 = scalar_lea.vmem [#allocation5], %s1582_s14 }
  0x14   : > { %s300_s20 = sshll.u32 %s290_s19, 4  ;;  %s298_s27 = sshll.u32 %s297_s18, 4  ;;  %s301_s20 = int_to_ptr.vmem [resolvable:$true] %s300_s20  ;;  %s299_s27 = int_to_ptr.hbm [resolvable:$true] %s298_s27 }
  0x15   : > { %p1689_p0 = pnand %p1696_p13, %p2085_p4  ;;  %p1585_p1 = scmp.ge.s32.totalorder %s2000_s26, 1 }
  0x16   : > { %s287_s28 = scalar_lea.sflag [#allocation6], %s286_s13  ;;  %s2002_s30 = smov 256  }
  0x17   : > { %s2003_s8 = smov 16   ;;  %p308_p2 = scmp.lt.s32.totalorder %s2000_s26, 3 }
  0x18   : > { %1691 = dma.hbm_to_vmem [thread:$0]  (!%p1689_p0), %s299_s27, 2048, %s301_s20, %s287_s28, %s2002_s30, %s2002_s30, %s2003_s8  }
  0x19   : > { %p309_p3 = pnand %p1585_p1, %p308_p2 }
  0x1b   : > { %312 = sbr.rel (%p309_p3) target bundleno = 1026 (0x402), region = 44 }
  0x20   : > { %s2118_s29 = sand.u32 1, %s1984_s22  }
  0x21   : > { %s1586_s14 = sshll.u32 %s2118_s29, 7  ;;  %s315_s15 = scalar_lea.sflag [#allocation6], %s2118_s29 }
  0x22   : > { %s2124_s7 = scalar_lea.vmem [#allocation5], %s1586_s14 }
  0x23   : > { %1971 = dma.done.wait (%p2091_p8), %s315_s15, 2048  }
  0x24   : > { %1973 = vsyncadd (%p2091_p8), %s315_s15, 4294965248  ;;  %p376_p4 = scmp.lt.s32.totalorder %s1992_s24, 1  ;;  %vm472_vm0 = vcmask 130048   ;;  %vm777_vm2 = vcmask 1040384   ;;  %s1938_s20 = scalar_lea.hbm %s2923_s6, 256 }
  0x26   : > { %s377_s13 = scalar_select %p376_p4, %s1992_s24, 1 }
  0x28   : > { %s2132_s16 = sshll.u32 %s377_s13, 4 }
  0x29   : > { %s393_s19 = scalar_lea.vmem %s2918_s1, %s2132_s16  ;;  %s383_s28 = scalar_lea.vmem %s2917_s0, %s2132_s16 }
  0x2a   : > { %v1677_v0 = vld [vmem:[%s393_s19 + $0x4] sm:$0xf]  ;;  %v1596_v1 = vld [vmem:[%s393_s19] sm:$0xf]  ;;  %v1598_v2 = vld [vmem:[%s393_s19 + $0x8] sm:$0xf0]  ;;  %s2662_s8 = scalar_lea.vmem %s2919_s2, %s2132_s16 }
  0x2b   : > { %v1678_v3 = vld [vmem:[%s393_s19 + $0x4] sm:$0xf0]  ;;  %v1601_v4 = vor.u32 %v1677_v0, %v1598_v2  ;;  %v1604_v5 = vld [vmem:[%s383_s28] sm:$0xf]  ;;  %v1675_v9 = vld [vmem:[%s383_s28 + $0x4] sm:$0xf] }
  0x2c   : > { %v1676_v6 = vld [vmem:[%s383_s28 + $0x4] sm:$0xf0]  ;;  %v1597_v7 = vor.u32 %v1678_v3, %v1596_v1  ;;  %v1606_v10 = vld [vmem:[%s383_s28 + $0x8] sm:$0xf0]  ;;  %s2845_s28 = scalar_lea.vmem [#allocation8], %s1586_s14  ;;  %s1681_s14 = sshll.u32 %s1992_s24, 7 }
  0x2d   : > { %v1605_v8 = vor.u32 %v1676_v6, %v1604_v5  ;;  %v1609_v11 = vor.u32 %v1675_v9, %v1606_v10  ;;  %s1431_s15 = sshll.u32 %s2845_s28, 4  ;;  %s1417_s16 = scalar_lea.sflag [#allocation7], %s2118_s29  ;;  %s1432_s15 = int_to_ptr.vmem [resolvable:$true] %s1431_s15 }
  0x2e   : > { %438 = vxpose.binary.xlu0.c.b16.start.end [1/2] (short) %v1601_v4, %v1597_v7, 128 }
  0x2f   : > { %528 = vmatpush.bf16.msra.mxu0 %v1605_v8  ;;  %617 = vmatpush.bf16.msra.mxu1 %v1609_v11 }
  0x30   : > { %1682 = vmatpush.bf16.msra.mxu2 %v1605_v8  ;;  %1683 = vmatpush.bf16.msra.mxu3 %v1609_v11 }
  0xda   : > { %v446_v12 = vpop.trf.xlu0 }
  0xdb   : > { %1610 = vmatmul.msk.bf16.vlgmr.msra.gmra.mxu0 %vm472_vm0, %v446_v12  ;;  %1626 = vmatmul.msk.bf16.vlgmr.msra.gmra.mxu1 %vm472_vm0, %v446_v12 }
  0xe2   : > { %v447_v13 = vpop.trf.xlu0 }
  0xea   : > { %v448_v14 = vpop.trf.xlu0 }
  0xeb   : > { %1611 = vmatmul.msk.bf16.gmra.mxu0 %vm472_vm0, %v448_v14  ;;  %1627 = vmatmul.msk.bf16.gmra.mxu1 %vm472_vm0, %v448_v14 }
  0xf2   : > { %v449_v15 = vpop.trf.xlu0 }
  0xfa   : > { %v450_v16 = vpop.trf.xlu0 }
  0xfb   : > { %1612 = vmatmul.msk.bf16.gmra.mxu0 %vm472_vm0, %v450_v16  ;;  %1628 = vmatmul.msk.bf16.gmra.mxu1 %vm472_vm0, %v450_v16 }
 0x102   : > { %v451_v17 = vpop.trf.xlu0 }
 0x10a   : > { %v452_v18 = vpop.trf.xlu0 }
 0x10b   : > { %1613 = vmatmul.msk.bf16.gmra.mxu0 %vm472_vm0, %v452_v18  ;;  %1629 = vmatmul.msk.bf16.gmra.mxu1 %vm472_vm0, %v452_v18 }
 0x112   : > { %v453_v19 = vpop.trf.xlu0 }
 0x11a   : > { %v454_v20 = vpop.trf.xlu0 }
 0x11b   : > { %1614 = vmatmul.msk.bf16.gmra.mxu0 %vm472_vm0, %v454_v20  ;;  %1630 = vmatmul.msk.bf16.gmra.mxu1 %vm472_vm0, %v454_v20 }
 0x122   : > { %v455_v21 = vpop.trf.xlu0 }
 0x123   : > { %1622 = vmatmul.msk.bf16.vlgmr.msra.gmra.mxu2 %vm472_vm0, %v455_v21  ;;  %1638 = vmatmul.msk.bf16.vlgmr.msra.gmra.mxu3 %vm472_vm0, %v455_v21 }
 0x12a   : > { %v456_v22 = vpop.trf.xlu0 }
 0x12b   : > { %1615 = vmatmul.msk.bf16.gmra.mxu0 %vm472_vm0, %v456_v22  ;;  %1631 = vmatmul.msk.bf16.gmra.mxu1 %vm472_vm0, %v456_v22 }
 0x132   : > { %v457_v23 = vpop.trf.xlu0 }
 0x133   : > { %1623 = vmatmul.msk.bf16.gmra.mxu2 %vm472_vm0, %v457_v23  ;;  %1639 = vmatmul.msk.bf16.gmra.mxu3 %vm472_vm0, %v457_v23 }
 0x13a   : > { %v458_v24 = vpop.trf.xlu0 }
 0x13b   : > { %1616 = vmatmul.msk.bf16.gmra.mxu0 %vm472_vm0, %v458_v24  ;;  %1632 = vmatmul.msk.bf16.gmra.mxu1 %vm472_vm0, %v458_v24 }
 0x142   : > { %v459_v25 = vpop.trf.xlu0 }
 0x143   : > { %1624 = vmatmul.msk.bf16.gmra.mxu2 %vm472_vm0, %v459_v25  ;;  %1640 = vmatmul.msk.bf16.gmra.mxu3 %vm472_vm0, %v459_v25 }
 0x14a   : > { %v460_v26 = vpop.trf.xlu0 }
 0x14b   : > { %1617 = vmatmul.msk.bf16.gmra.mxu0 %vm472_vm0, %v460_v26  ;;  %1633 = vmatmul.msk.bf16.gmra.mxu1 %vm472_vm0, %v460_v26 }
 0x152   : > { %v461_v31 = vpop.trf.xlu0 }
 0x153   : > { %1625 = vmatmul.msk.bf16.gmra.mxu2 %vm472_vm0, %v461_v31  ;;  %1641 = vmatmul.msk.bf16.gmra.mxu3 %vm472_vm0, %v461_v31 }
 0x158   : > { %v2164_v27 = vpop.f32.mrf.mxu0  ;;  %v2166_v28 = vpop.f32.mrf.mxu1 }
 0x15b   : > { %1618 = vmatmul.msk.bf16.gmra.mxu0 %vm472_vm0, %v447_v13  ;;  %1634 = vmatmul.msk.bf16.gmra.mxu1 %vm472_vm0, %v447_v13 }
 0x160   : > { %v2170_v29 = vpop.f32.mrf.mxu0  ;;  %v2172_v30 = vpop.f32.mrf.mxu1 }
 0x168   : > { %v2176_v32 = vpop.f32.mrf.mxu0  ;;  %v2178_v33 = vpop.f32.mrf.mxu1 }
 0x169   : > { %v700_v12 = vmax.f32 %v2164_v27, %v2176_v32  ;;  %v737_v13 = vmax.f32 %v2166_v28, %v2178_v33 }
 0x16b   : > { %1619 = vmatmul.msk.bf16.gmra.mxu0 %vm472_vm0, %v449_v15  ;;  %1635 = vmatmul.msk.bf16.gmra.mxu1 %vm472_vm0, %v449_v15 }
 0x170   : > { %v2182_v34 = vpop.f32.mrf.mxu0  ;;  %v2184_v35 = vpop.f32.mrf.mxu1 }
 0x171   : > { %v701_v22 = vmax.f32 %v2170_v29, %v2182_v34  ;;  %v738_v23 = vmax.f32 %v2172_v30, %v2184_v35 }
 0x178   : > { %v2186_v36 = vpop.f32.mrf.mxu0  ;;  %v2188_v37 = vpop.f32.mrf.mxu1 }
 0x179   : > { %v702_v14 = vmax.f32 %v700_v12, %v2186_v36  ;;  %v739_v15 = vmax.f32 %v737_v13, %v2188_v37 }
 0x17b   : > { %1620 = vmatmul.msk.bf16.gmra.mxu0 %vm472_vm0, %v451_v17  ;;  %1636 = vmatmul.msk.bf16.gmra.mxu1 %vm472_vm0, %v451_v17 }
 0x180   : > { %v2192_v38 = vpop.f32.mrf.mxu0  ;;  %v2194_v39 = vpop.f32.mrf.mxu1 }
 0x181   : > { %v703_v12 = vmax.f32 %v701_v22, %v2192_v38  ;;  %v740_v13 = vmax.f32 %v738_v23, %v2194_v39 }
 0x188   : > { %v2196_v40 = vpop.f32.mrf.mxu0  ;;  %v2198_v41 = vpop.f32.mrf.mxu1 }
 0x189   : > { %v704_v18 = vmax.f32 %v702_v14, %v2196_v40 }
 0x18b   : > { %1621 = vmatmul.msk.bf16.gmra.mxu0 %vm472_vm0, %v453_v19  ;;  %1637 = vmatmul.msk.bf16.gmra.mxu1 %vm472_vm0, %v453_v19  ;;  %v741_v19 = vmax.f32 %v739_v15, %v2198_v41 }
 0x190   : > { %v2202_v42 = vpop.f32.mrf.mxu0  ;;  %v2204_v43 = vpop.f32.mrf.mxu1 }
 0x198   : > { %v2206_v44 = vpop.f32.mrf.mxu0  ;;  %v2208_v45 = vpop.f32.mrf.mxu1 }
 0x199   : > { %2956 = vst [vmem:[#allocation12_spill] sm:$0xff] %v2206_v44  ;;  %v706_v20 = vmax.f32 %v704_v18, %v2206_v44  ;;  %v743_v21 = vmax.f32 %v741_v19, %v2208_v45  ;;  %v705_v18 = vmax.f32 %v703_v12, %v2202_v42  ;;  %v742_v19 = vmax.f32 %v740_v13, %v2204_v43 }
 0x19a   : > { %2957 = vst [vmem:[#allocation13_spill] sm:$0xff] %v2208_v45 }
 0x1a0   : > { %v2210_v46 = vpop.f32.mrf.mxu0  ;;  %v2212_v47 = vpop.f32.mrf.mxu1 }
 0x1a1   : > { %v707_v22 = vmax.f32 %v705_v18, %v2210_v46  ;;  %v744_v23 = vmax.f32 %v742_v19, %v2212_v47 }
 0x1a6   : > { %v2238_v60 = vpop.f32.mrf.mxu2  ;;  %v2240_v61 = vpop.f32.mrf.mxu3 }
 0x1a7   : > { %2960 = vst [vmem:[#allocation16_spill] sm:$0xff] %v2238_v60 }
 0x1a8   : > { %v2214_v48 = vpop.f32.mrf.mxu0  ;;  %v2216_v49 = vpop.f32.mrf.mxu1  ;;  %2961 = vst [vmem:[#allocation17_spill] sm:$0xff] %v2240_v61 }
 0x1a9   : > { %2958 = vst [vmem:[#allocation14_spill] sm:$0xff] %v2216_v49  ;;  %v708_v26 = vmax.f32 %v706_v20, %v2214_v48  ;;  %v745_v31 = vmax.f32 %v743_v21, %v2216_v49  ;;  %v412_v49 = vlaneseq }
 0x1ab   : > { %vm2310_vm1 = vcmp.lt.s32.totalorder %v412_v49, 256 }
 0x1ae   : > { %v2246_v0 = vpop.f32.mrf.mxu2  ;;  %v2248_v1 = vpop.f32.mrf.mxu3 }
 0x1af   : > { %2964 = vst [vmem:[#allocation20_spill] sm:$0xff] %v2246_v0 }
 0x1b0   : > { %v2218_v50 = vpop.f32.mrf.mxu0  ;;  %v2220_v51 = vpop.f32.mrf.mxu1  ;;  %2965 = vst [vmem:[#allocation21_spill] sm:$0xff] %v2248_v1 }
 0x1b1   : > { %v709_v13 = vmax.f32 %v707_v22, %v2218_v50 }
 0x1b6   : > { %v2254_v4 = vpop.f32.mrf.mxu2  ;;  %v2256_v5 = vpop.f32.mrf.mxu3 }
 0x1b7   : > { %2966 = vst [vmem:[#allocation22_spill] sm:$0xff] %v2254_v4 }
 0x1b8   : > { %v2222_v52 = vpop.f32.mrf.mxu0  ;;  %v2224_v53 = vpop.f32.mrf.mxu1  ;;  %2967 = vst [vmem:[#allocation23_spill] sm:$0xff] %v2256_v5 }
 0x1b9   : > { %2959 = vst [vmem:[#allocation15_spill] sm:$0xff] %v2224_v53  ;;  %v710_v14 = vmax.f32 %v708_v26, %v2222_v52  ;;  %v747_v15 = vmax.f32 %v745_v31, %v2224_v53  ;;  %v2004_v53 = vmov -inf  }
 0x1ba   : > { %416 = vst.msk [vmem:[#allocation2] sm:$0x3] %vm2310_vm1, %v2004_v53 }
 0x1be   : > { %v2266_v10 = vpop.f32.mrf.mxu2  ;;  %v2268_v11 = vpop.f32.mrf.mxu3 }
 0x1bf   : > { %2970 = vst [vmem:[#allocation26_spill] sm:$0xff] %v2266_v10 }
 0x1c0   : > { %v2226_v54 = vpop.f32.mrf.mxu0  ;;  %v2228_v55 = vpop.f32.mrf.mxu1  ;;  %2971 = vst [vmem:[#allocation27_spill] sm:$0xff] %v2268_v11 }
 0x1c1   : > { %v711_v19 = vmax.f32 %v709_v13, %v2226_v54 }
 0x1c6   : > { %v2288_v24 = vpop.f32.mrf.mxu2  ;;  %v2290_v25 = vpop.f32.mrf.mxu3 }
 0x1c7   : > { %2974 = vst [vmem:[#allocation30_spill] sm:$0xff] %v2290_v25 }
 0x1c8   : > { %v2230_v56 = vpop.f32.mrf.mxu0  ;;  %v2232_v57 = vpop.f32.mrf.mxu1 }
 0x1c9   : > { %v712_v20 = vmax.f32 %v710_v14, %v2230_v56  ;;  %v749_v21 = vmax.f32 %v747_v15, %v2232_v57  ;;  %v746_v14 = vmax.f32 %v744_v23, %v2220_v51  ;;  %v2005_v23 = vmov 0.0  }
 0x1ca   : > { %417 = vst.msk [vmem:[#allocation3] sm:$0x3] %vm2310_vm1, %v2005_v23 }
 0x1ce   : > { %v2323_v49 = vpop.f32.mrf.mxu3 }
 0x1cf   : > { %2979 = vst [vmem:[#allocation33_spill] sm:$0xff] %v2323_v49 }
 0x1d0   : > { %v2234_v58 = vpop.f32.mrf.mxu0  ;;  %v2236_v59 = vpop.f32.mrf.mxu1 }
 0x1d8   : > { %v2242_v62 = vpop.f32.mrf.mxu0  ;;  %v2244_v63 = vpop.f32.mrf.mxu1 }
 0x1d9   : > { %2962 = vst [vmem:[#allocation18_spill] sm:$0xff] %v2242_v62  ;;  %v714_v26 = vmax.f32 %v712_v20, %v2242_v62  ;;  %v751_v31 = vmax.f32 %v749_v21, %v2244_v63  ;;  %v2321_v20 = vpop.f32.mrf.mxu2  ;;  %v748_v21 = vmax.f32 %v746_v14, %v2228_v55 }
 0x1da   : > { %2963 = vst [vmem:[#allocation19_spill] sm:$0xff] %v2244_v63 }
 0x1db   : > { %2978 = vst [vmem:[#allocation32_spill] sm:$0xff] %v2321_v20 }
 0x1e0   : > { %v2250_v2 = vpop.f32.mrf.mxu0  ;;  %v2252_v3 = vpop.f32.mrf.mxu1 }
 0x1e8   : > { %v2258_v6 = vpop.f32.mrf.mxu0  ;;  %v2260_v7 = vpop.f32.mrf.mxu1 }
 0x1e9   : > { %2968 = vst [vmem:[#allocation24_spill] sm:$0xff] %v2258_v6  ;;  %v716_v15 = vmax.f32 %v714_v26, %v2258_v6  ;;  %v753_v18 = vmax.f32 %v751_v31, %v2260_v7  ;;  %v713_v26 = vmax.f32 %v711_v19, %v2234_v58  ;;  %v750_v31 = vmax.f32 %v748_v21, %v2236_v59  ;;  %v2344_v6 = vpop.f32.mrf.mxu2  ;;  %v2346_v19 = vpop.f32.mrf.mxu3 }
 0x1ea   : > { %2969 = vst [vmem:[#allocation25_spill] sm:$0xff] %v2260_v7 }
 0x1f0   : > { %v2262_v8 = vpop.f32.mrf.mxu0  ;;  %v2264_v9 = vpop.f32.mrf.mxu1 }
 0x1f8   : > { %v2276_v16 = vpop.f32.mrf.mxu0  ;;  %v2278_v17 = vpop.f32.mrf.mxu1 }
 0x1f9   : > { %2972 = vst [vmem:[#allocation28_spill] sm:$0xff] %v2276_v16  ;;  %v718_v22 = vmax.f32 %v716_v15, %v2276_v16  ;;  %v755_v63 = vmax.f32 %v753_v18, %v2278_v17  ;;  %v715_v15 = vmax.f32 %v713_v26, %v2250_v2  ;;  %v752_v18 = vmax.f32 %v750_v31, %v2252_v3 }
 0x1fa   : > { %2973 = vst [vmem:[#allocation29_spill] sm:$0xff] %v2278_v17 }
 0x1fb   : > { %v717_v17 = vmax.f32 %v715_v15, %v2262_v8  ;;  %v754_v16 = vmax.f32 %v752_v18, %v2264_v9 }
 0x200   : > { %v2300_v45 = vpop.f32.mrf.mxu0  ;;  %v2302_v44 = vpop.f32.mrf.mxu1 }
 0x201   : > { %2975 = vst [vmem:[#allocation31_spill] sm:$0xff] %v2302_v44  ;;  %v719_v21 = vmax.f32 %v717_v17, %v2300_v45 }
 0x208   : > { %v2328_v62 = vpop.f32.mrf.mxu0  ;;  %v2330_v53 = vpop.f32.mrf.mxu1 }
 0x209   : > { %v720_v13 = vmax.f32 %v718_v22, %v2328_v62  ;;  %v757_v14 = vmax.f32 %v755_v63, %v2330_v53  ;;  %v756_v63 = vmax.f32 %v754_v16, %v2302_v44 }
 0x20b   : > { %v722_v7 = vmax.f32 %v720_v13, %v2238_v60  ;;  %v759_v23 = vmax.f32 %v757_v14, %v2240_v61 }
 0x20d   : > { %v724_v31 = vmax.f32 %v722_v7, %v2254_v4  ;;  %v761_v15 = vmax.f32 %v759_v23, %v2256_v5  ;;  %v2366_v5 = vpop.f32.mrf.mxu2 }
 0x20f   : > { %v726_v17 = vmax.f32 %v724_v31, %v2288_v24  ;;  %v763_v16 = vmax.f32 %v761_v15, %v2290_v25 }
 0x210   : > { %v2350_v22 = vpop.f32.mrf.mxu0  ;;  %v2352_v26 = vpop.f32.mrf.mxu1 }
 0x211   : > { %v721_v13 = vmax.f32 %v719_v21, %v2350_v22  ;;  %v758_v14 = vmax.f32 %v756_v63, %v2352_v26  ;;  %v2368_v21 = vpop.f32.mrf.mxu3  ;;  %v728_v63 = vmax.f32 %v726_v17, %v2344_v6 }
 0x213   : > { %v723_v18 = vmax.f32 %v721_v13, %v2246_v0  ;;  %v760_v61 = vmax.f32 %v758_v14, %v2248_v1  ;;  %v765_v13 = vmax.f32 %v763_v16, %v2346_v19  ;;  %v2374_v16 = vld [vmem:[#allocation2] sm:$0x3] }
 0x215   : > { %v725_v44 = vmax.f32 %v723_v18, %v2266_v10  ;;  %v762_v60 = vmax.f32 %v760_v61, %v2268_v11 }
 0x217   : > { %v727_v7 = vmax.f32 %v725_v44, %v2321_v20  ;;  %v764_v23 = vmax.f32 %v762_v60, %v2323_v49 }
 0x219   : > { %v729_v31 = vmax.f32 %v727_v7, %v2366_v5  ;;  %v766_v15 = vmax.f32 %v764_v23, %v2368_v21 }
 0x21b   : > { %v730_v14 = vmax.f32 %v728_v63, %v729_v31  ;;  %v767_v18 = vmax.f32 %v765_v13, %v766_v15 }
 0x21d   : > { %v731_v25 = vrot.slane %v730_v14, 4  ;;  %v768_v61 = vrot.slane %v767_v18, 4 }
 0x21f   : > { %v732_v11 = vmax.f32 %v730_v14, %v731_v25  ;;  %v769_v44 = vmax.f32 %v767_v18, %v768_v61 }
 0x221   : > { %v733_v1 = vrot.slane %v732_v11, 2  ;;  %v770_v60 = vrot.slane %v769_v44, 2 }
 0x223   : > { %v734_v49 = vmax.f32 %v732_v11, %v733_v1  ;;  %v771_v0 = vmax.f32 %v769_v44, %v770_v60 }
 0x225   : > { %v735_v10 = vrot.slane %v734_v49, 1  ;;  %v772_v4 = vrot.slane %v771_v0, 1 }
 0x227   : > { %v773_v20 = vmax.f32 %v771_v0, %v772_v4  ;;  %v736_v17 = vmax.f32 %v734_v49, %v735_v10 }
 0x229   : > { %v776_v7 = vrot.slane %v773_v20, 7 }
 0x22b   : > { %v778_v23 = vsel %vm777_vm2, %v736_v17, %v776_v7 }
 0x22c   : > { %v2378_v63 = vmax.f32 %v2374_v16, %v778_v23 }
 0x22e   : > { %1187 = vst.msk [vmem:[#allocation2] sm:$0x3] %vm2310_vm1, %v2378_v63  ;;  %v2386_v1 = vperm.slane %v2378_v63, 0  ;;  %v2389_v0 = vperm.slane %v2378_v63, 1 }
 0x230   : > { %v789_v4 = vsub.f32 %v2164_v27, %v2386_v1  ;;  %v790_v10 = vsub.f32 %v2166_v28, %v2389_v0  ;;  %v791_v11 = vsub.f32 %v2170_v29, %v2386_v1  ;;  %v792_v20 = vsub.f32 %v2172_v30, %v2389_v0 }
 0x231   : > { %v793_v49 = vsub.f32 %v2176_v32, %v2386_v1  ;;  %v794_v31 = vsub.f32 %v2178_v33, %v2389_v0  ;;  %v795_v27 = vsub.f32 %v2182_v34, %v2386_v1  ;;  %v796_v28 = vsub.f32 %v2184_v35, %v2389_v0 }
 0x232   : > { %v853_v13 = vmul.f32 1.442695, %v789_v4  ;;  %v855_v15 = vmul.f32 1.442695, %v790_v10  ;;  %v857_v14 = vmul.f32 1.442695, %v791_v11  ;;  %v797_v29 = vsub.f32 %v2186_v36, %v2386_v1 }
 0x233   : > { %v859_v18 = vmul.f32 1.442695, %v792_v20  ;;  %v861_v30 = vmul.f32 1.442695, %v793_v49  ;;  %v798_v32 = vsub.f32 %v2188_v37, %v2389_v0  ;;  %v863_v61 = vmul.f32 1.442695, %v794_v31 }
 0x234   : > { %1756 = vpow2.f32 %v853_v13  ;;  %v799_v33 = vsub.f32 %v2192_v38, %v2386_v1  ;;  %v865_v34 = vmul.f32 1.442695, %v795_v27  ;;  %v800_v44 = vsub.f32 %v2194_v39, %v2389_v0  ;;  %v2981_v27 = vld [vmem:[#allocation13_spill] sm:$0xff] }
 0x235   : > { %1758 = vpow2.f32 %v855_v15  ;;  %v867_v35 = vmul.f32 1.442695, %v796_v28  ;;  %v817_v36 = vsub.f32 %v2230_v56, %v2386_v1  ;;  %v869_v60 = vmul.f32 1.442695, %v797_v29  ;;  %v2980_v15 = vld [vmem:[#allocation12_spill] sm:$0xff] }
 0x236   : > { %1760 = vpow2.f32 %v857_v14  ;;  %v819_v37 = vsub.f32 %v2234_v58, %v2386_v1  ;;  %v871_v17 = vmul.f32 1.442695, %v798_v32  ;;  %v801_v38 = vsub.f32 %v2196_v40, %v2386_v1 }
 0x237   : > { %1762 = vpow2.f32 %v859_v18  ;;  %v873_v23 = vmul.f32 1.442695, %v799_v33  ;;  %v813_v4 = vsub.f32 %v2222_v52, %v2386_v1  ;;  %v875_v56 = vmul.f32 1.442695, %v800_v44 }
 0x238   : > { %1764 = vpow2.f32 %v861_v30  ;;  %v802_v58 = vsub.f32 %v2198_v41, %v2389_v0  ;;  %v815_v11 = vsub.f32 %v2226_v54, %v2386_v1  ;;  %v909_v20 = vmul.f32 1.442695, %v817_v36  ;;  %v2983_v36 = vld [vmem:[#allocation15_spill] sm:$0xff] }
 0x239   : > { %1766 = vpow2.f32 %v863_v61  ;;  %v803_v49 = vsub.f32 %v2202_v42, %v2386_v1  ;;  %v804_v52 = vsub.f32 %v2204_v43, %v2389_v0  ;;  %v913_v13 = vmul.f32 1.442695, %v819_v37 }
 0x23a   : > { %v2419_v7 = vpop.eup %1756  ;;  %1768 = vpow2.f32 %v865_v34  ;;  %v805_v41 = vsub.f32 %v2980_v15, %v2386_v1  ;;  %v806_v54 = vsub.f32 %v2981_v27, %v2389_v0  ;;  %v877_v14 = vmul.f32 1.442695, %v801_v38  ;;  %v2982_v34 = vld [vmem:[#allocation14_spill] sm:$0xff]  ;;  %v2985_v15 = vld [vmem:[#allocation19_spill] sm:$0xff] }
 0x23b   : > { %v2423_v39 = vpop.eup %1758  ;;  %1770 = vpow2.f32 %v867_v35  ;;  %v807_v42 = vsub.f32 %v2210_v46, %v2386_v1  ;;  %v809_v43 = vsub.f32 %v2214_v48, %v2386_v1  ;;  %v901_v18 = vmul.f32 1.442695, %v813_v4 }
 0x23c   : > { %v2427_v10 = vpop.eup %1760  ;;  %1772 = vpow2.f32 %v869_v60  ;;  %v808_v30 = vsub.f32 %v2212_v47, %v2389_v0  ;;  %v811_v32 = vsub.f32 %v2218_v50, %v2386_v1  ;;  %v905_v61 = vmul.f32 1.442695, %v815_v11 }
 0x23d   : > { %v2433_v40 = vpop.eup %1762  ;;  %1774 = vpow2.f32 %v871_v17  ;;  %v810_v46 = vsub.f32 %v2982_v34, %v2389_v0  ;;  %v812_v48 = vsub.f32 %v2220_v51, %v2389_v0  ;;  %v879_v44 = vmul.f32 1.442695, %v802_v58 }
 0x23e   : > { %v2439_v31 = vpop.eup %1764  ;;  %1776 = vpow2.f32 %v873_v23  ;;  %v814_v47 = vsub.f32 %v2983_v36, %v2389_v0  ;;  %v881_v60 = vmul.f32 1.442695, %v803_v49  ;;  %v983_v50 = vadd.f32 %v2427_v10, %v2419_v7  ;;  %v2984_v49 = vld [vmem:[#allocation18_spill] sm:$0xff] }
 0x23f   : > { %v2445_v28 = vpop.eup %1766  ;;  %1778 = vpow2.f32 %v875_v56  ;;  %v893_v23 = vmul.f32 1.442695, %v809_v43  ;;  %v897_v58 = vmul.f32 1.442695, %v811_v32  ;;  %v883_v32 = vmul.f32 1.442695, %v804_v52 }
 0x240   : > { %v2451_v29 = vpop.eup %1768  ;;  %1780 = vpow2.f32 %v909_v20  ;;  %v984_v11 = vadd.f32 %v2439_v31, %v983_v50  ;;  %v833_v50 = vsub.f32 %v2328_v62, %v2386_v1  ;;  %v834_v25 = vsub.f32 %v2330_v53, %v2389_v0  ;;  %v2986_v56 = vld [vmem:[#allocation24_spill] sm:$0xff] }
 0x241   : > { %v2457_v33 = vpop.eup %1770  ;;  %1782 = vpow2.f32 %v913_v13  ;;  %v889_v27 = vmul.f32 1.442695, %v807_v42  ;;  %v1020_v62 = vadd.f32 %v2433_v40, %v2423_v39  ;;  %v825_v38 = vsub.f32 %v2986_v56, %v2386_v1 }
 0x242   : > { %v2463_v35 = vpop.eup %1772  ;;  %1784 = vpow2.f32 %v877_v14  ;;  %v885_v14 = vmul.f32 1.442695, %v805_v41  ;;  %v2988_v51 = vsub.f32 %v2228_v55, %v2389_v0  ;;  %v2990_v36 = vsub.f32 %v2232_v57, %v2389_v0 }
 0x243   : > { %v2469_v37 = vpop.eup %1774  ;;  %1786 = vpow2.f32 %v901_v18  ;;  %v887_v18 = vmul.f32 1.442695, %v806_v54  ;;  %v831_v55 = vsub.f32 %v2300_v45, %v2386_v1  ;;  %v849_v57 = vsub.f32 %v2344_v6, %v2386_v1 }
 0x244   : > { %v2475_v4 = vpop.eup %1776  ;;  %1788 = vpow2.f32 %v905_v61  ;;  %v985_v61 = vadd.f32 %v2451_v29, %v984_v11  ;;  %v891_v11 = vmul.f32 1.442695, %v808_v30  ;;  %v851_v6 = vsub.f32 %v2366_v5, %v2386_v1 }
 0x245   : > { %v2480_v20 = vpop.eup %1778  ;;  %1790 = vpow2.f32 %v879_v44  ;;  %v835_v44 = vsub.f32 %v2350_v22, %v2386_v1  ;;  %v895_v22 = vmul.f32 1.442695, %v810_v46 }
 0x246   : > { %v2486_v43 = vpop.eup %1780  ;;  %1792 = vpow2.f32 %v881_v60  ;;  %v986_v52 = vadd.f32 %v2463_v35, %v985_v61  ;;  %v1021_v61 = vadd.f32 %v2445_v28, %v1020_v62  ;;  %v2987_v62 = vld [vmem:[#allocation25_spill] sm:$0xff] }
 0x247   : > { %v2491_v34 = vpop.eup %1782  ;;  %1794 = vpow2.f32 %v893_v23  ;;  %v836_v23 = vsub.f32 %v2352_v26, %v2389_v0  ;;  %v943_v26 = vmul.f32 1.442695, %v834_v25  ;;  %v827_v25 = vsub.f32 %v2262_v8, %v2386_v1 }
 0x248   : > { %v2497_v41 = vpop.eup %1784  ;;  %1796 = vpow2.f32 %v897_v58  ;;  %v1095_v53 = vpack.c.bf16 %v2491_v34, %v2486_v43  ;;  %v987_v54 = vadd.f32 %v2475_v4, %v986_v52  ;;  %v945_v52 = vmul.f32 1.442695, %v835_v44 }
 0x249   : > { %v2502_v60 = vpop.eup %1786  ;;  %1798 = vpow2.f32 %v885_v14  ;;  %v941_v14 = vmul.f32 1.442695, %v833_v50  ;;  %v1022_v17 = vadd.f32 %v2457_v33, %v1021_v61  ;;  %v947_v30 = vmul.f32 1.442695, %v836_v23 }
 0x24a   : > { %v2508_v42 = vpop.eup %1788  ;;  %1800 = vpow2.f32 %v883_v32  ;;  %1123 = vmatpush.bf16.msrb.mxu2 %v1095_v53  ;;  %v988_v46 = vadd.f32 %v2497_v41, %v987_v54  ;;  %v826_v53 = vsub.f32 %v2987_v62, %v2389_v0  ;;  %v899_v44 = vmul.f32 1.442695, %v812_v48  ;;  %v3002_v62 = vld [vmem:[#allocation31_spill] sm:$0xff] }
 0x24b   : > { %v2513_v58 = vpop.eup %1790  ;;  %1802 = vpow2.f32 %v889_v27  ;;  %v1093_v27 = vpack.c.bf16 %v2508_v42, %v2502_v60  ;;  %v903_v23 = vmul.f32 1.442695, %v814_v47  ;;  %v907_v48 = vmul.f32 1.442695, %v2988_v51 }
 0x24c   : > { %v2518_v13 = vpop.eup %1792  ;;  %1804 = vpow2.f32 %v887_v18  ;;  %v911_v47 = vmul.f32 1.442695, %v2990_v36  ;;  %v929_v5 = vmul.f32 1.442695, %v827_v25  ;;  %v845_v25 = vsub.f32 %v2288_v24, %v2386_v1 }
 0x24d   : > { %v1795_v32 = vpop.eup %1794  ;;  %1806 = vpow2.f32 %v891_v11  ;;  %v989_v56 = vadd.f32 %v2518_v13, %v988_v46  ;;  %v1023_v11 = vadd.f32 %v2469_v37, %v1022_v17  ;;  %v937_v24 = vmul.f32 1.442695, %v831_v55 }
 0x24e   : > { %v1797_v50 = vpop.eup %1796  ;;  %1808 = vpow2.f32 %v895_v22  ;;  %1124 = vmatpush.bf16.msrb.mxu2 %v1093_v27  ;;  %v2989_v27 = vld [vmem:[#allocation28_spill] sm:$0xff] }
 0x24f   : > { %v1799_v18 = vpop.eup %1798  ;;  %1810 = vpow2.f32 %v941_v14  ;;  %v1024_v17 = vadd.f32 %v2480_v20, %v1023_v11  ;;  %v1091_v14 = vpack.c.bf16 %v1797_v50, %v1795_v32  ;;  %v829_v22 = vsub.f32 %v2989_v27, %v2386_v1 }
 0x250   : > { %v2535_v54 = vpop.eup %1800  ;;  %1812 = vpow2.f32 %v943_v26  ;;  %v990_v61 = vadd.f32 %v1799_v18, %v989_v56 }
 0x251   : > { %v1803_v8 = vpop.eup %1802  ;;  %1814 = vpow2.f32 %v945_v52  ;;  %v2991_v52 = vsub.f32 %v2236_v59, %v2389_v0  ;;  %v1025_v51 = vadd.f32 %v2513_v58, %v1024_v17  ;;  %v2993_v59 = vsub.f32 %v2985_v15, %v2389_v0 }
 0x252   : > { %v2546_v46 = vpop.eup %1804  ;;  %1816 = vpow2.f32 %v947_v30  ;;  %v991_v26 = vadd.f32 %v1803_v8, %v990_v61  ;;  %1125 = vmatpush.bf16.msrb.mxu2 %v1091_v14  ;;  %v2992_v30 = vsub.f32 %v2984_v49, %v2386_v1  ;;  %v1089_v14 = vpack.c.bf16 %v1803_v8, %v1799_v18 }
 0x253   : > { %v2553_v56 = vpop.eup %1806  ;;  %1818 = vpow2.f32 %v899_v44  ;;  %v915_v11 = vmul.f32 1.442695, %v2991_v52  ;;  %v919_v44 = vmul.f32 1.442695, %v2993_v59  ;;  %v1026_v17 = vadd.f32 %v2535_v54, %v1025_v51  ;;  %v2996_v59 = vld [vmem:[#allocation32_spill] sm:$0xff] }
 0x254   : > { %v2561_v27 = vpop.eup %1808  ;;  %1820 = vpow2.f32 %v903_v23  ;;  %v917_v61 = vmul.f32 1.442695, %v2992_v30  ;;  %v992_v36 = vadd.f32 %v1795_v32, %v991_v26  ;;  %v2994_v49 = vsub.f32 %v2250_v2, %v2386_v1 }
 0x255   : > { %v2568_v45 = vpop.eup %1810  ;;  %1822 = vpow2.f32 %v907_v48  ;;  %v2995_v15 = vsub.f32 %v2252_v3, %v2389_v0  ;;  %v925_v51 = vmul.f32 1.442695, %v825_v38  ;;  %v1027_v18 = vadd.f32 %v2546_v46, %v1026_v17 }
 0x256   : > { %v2574_v52 = vpop.eup %1812  ;;  %1824 = vpow2.f32 %v911_v47  ;;  %v921_v32 = vmul.f32 1.442695, %v2994_v49  ;;  %v993_v23 = vadd.f32 %v1797_v50, %v992_v36  ;;  %1126 = vmatpush.bf16.msrb.mxu2 %v1089_v14  ;;  %v1087_v3 = vpack.c.bf16 %v2518_v13, %v2497_v41  ;;  %v2997_v14 = vld [vmem:[#allocation29_spill] sm:$0xff] }
 0x257   : > { %v2581_v26 = vpop.eup %1814  ;;  %1826 = vpow2.f32 %v915_v11  ;;  %v923_v48 = vmul.f32 1.442695, %v2995_v15  ;;  %v1028_v11 = vadd.f32 %v2553_v56, %v1027_v18  ;;  %v973_v17 = vmul.f32 1.442695, %v849_v57 }
 0x258   : > { %v2587_v8 = vpop.eup %1816  ;;  %1828 = vpow2.f32 %v917_v61  ;;  %v994_v47 = vadd.f32 %v2502_v60, %v993_v23  ;;  %v1103_v2 = vpack.c.bf16 %v2581_v26, %v2568_v45  ;;  %v933_v60 = vmul.f32 1.442695, %v829_v22 }
 0x259   : > { %v2592_v50 = vpop.eup %1818  ;;  %1830 = vpow2.f32 %v919_v44  ;;  %v1104_v38 = vpack.c.bf16 %v2587_v8, %v2574_v52  ;;  %v847_v44 = vsub.f32 %v2996_v59, %v2386_v1  ;;  %v1029_v13 = vadd.f32 %v2561_v27, %v1028_v11 }
 0x25a   : > { %v2599_v30 = vpop.eup %1820  ;;  %1832 = vpow2.f32 %v921_v32  ;;  %v995_v61 = vadd.f32 %v2508_v42, %v994_v47  ;;  %1127 = vmatpush.bf16.msrb.mxu2 %v1087_v3  ;;  %v830_v49 = vsub.f32 %v2997_v14, %v2389_v0  ;;  %v977_v32 = vmul.f32 1.442695, %v851_v6 }
 0x25b   : > { %v2604_v36 = vpop.eup %1822  ;;  %1834 = vpow2.f32 %v923_v48  ;;  %v1030_v23 = vadd.f32 %v2592_v50, %v1029_v13  ;;  %v1085_v57 = vpack.c.bf16 %v2475_v4, %v2463_v35  ;;  %v2998_v48 = vld [vmem:[#allocation22_spill] sm:$0xff]  ;;  %v965_v47 = vmul.f32 1.442695, %v845_v25  ;;  %v3000_v4 = vld [vmem:[#allocation16_spill] sm:$0xff] }
 0x25c   : > { %v2609_v41 = vpop.eup %1824  ;;  %1836 = vpow2.f32 %v925_v51  ;;  %v996_v22 = vadd.f32 %v2486_v43, %v995_v61  ;;  %v841_v18 = vsub.f32 %v2998_v48, %v2386_v1  ;;  %v2999_v43 = vld [vmem:[#allocation26_spill] sm:$0xff]  ;;  %v969_v6 = vmul.f32 1.442695, %v847_v44 }
 0x25d   : > { %v2614_v42 = vpop.eup %1826  ;;  %1838 = vpow2.f32 %v929_v5  ;;  %v843_v5 = vsub.f32 %v2999_v43, %v2386_v1  ;;  %v1031_v11 = vadd.f32 %v2599_v30, %v1030_v23  ;;  %v837_v3 = vsub.f32 %v3000_v4, %v2386_v1  ;;  %v3004_v4 = vld [vmem:[#allocation17_spill] sm:$0xff] }
 0x25e   : > { %v2619_v15 = vpop.eup %1828  ;;  %1840 = vpow2.f32 %v933_v60  ;;  %v997_v55 = vadd.f32 %v2491_v34, %v996_v22  ;;  %1128 = vmatpush.bf16.msrb.mxu2 %v1085_v57  ;;  %v927_v25 = vmul.f32 1.442695, %v826_v53  ;;  %v3001_v61 = vsub.f32 %v2264_v9, %v2389_v0  ;;  %v3003_v9 = vld [vmem:[#allocation20_spill] sm:$0xff] }
 0x25f   : > { %v2624_v51 = vpop.eup %1830  ;;  %1842 = vpow2.f32 %v973_v17  ;;  %v1032_v44 = vadd.f32 %v2604_v36, %v1031_v11  ;;  %v1083_v17 = vpack.c.bf16 %v2451_v29, %v2439_v31  ;;  %v832_v53 = vsub.f32 %v3002_v62, %v2389_v0 }
 0x260   : > { %v2629_v35 = vpop.eup %1832  ;;  %1844 = vpow2.f32 %v937_v24  ;;  %v998_v34 = vadd.f32 %v2619_v15, %v997_v55  ;;  %v931_v59 = vmul.f32 1.442695, %v3001_v61  ;;  %v957_v14 = vmul.f32 1.442695, %v841_v18 }
 0x261   : > { %v2637_v60 = vpop.eup %1834  ;;  %1846 = vpow2.f32 %v977_v32  ;;  %v839_v32 = vsub.f32 %v3003_v9, %v2386_v1  ;;  %v961_v23 = vmul.f32 1.442695, %v843_v5  ;;  %v1033_v57 = vadd.f32 %v2609_v41, %v1032_v44 }
 0x262   : > { %v2645_v13 = vpop.eup %1836  ;;  %1848 = vpow2.f32 %v965_v47  ;;  %v999_v24 = vadd.f32 %v2629_v35, %v998_v34  ;;  %1129 = vmatpush.bf16.msrb.mxu2 %v1083_v17  ;;  %v935_v29 = vmul.f32 1.442695, %v830_v49  ;;  %v949_v1 = vmul.f32 1.442695, %v837_v3 }
 0x263   : > { %v2650_v22 = vpop.eup %1838  ;;  %1850 = vpow2.f32 %v969_v6  ;;  %v1034_v47 = vadd.f32 %v2614_v42, %v1033_v57  ;;  %v1081_v55 = vpack.c.bf16 %v2427_v10, %v2419_v7  ;;  %v939_v49 = vmul.f32 1.442695, %v832_v53  ;;  %v1644_v7 = vld [vmem:[%s2662_s8] sm:$0xf]  ;;  %v1680_v10 = vld [vmem:[%s2662_s8 + $0x4] sm:$0xf0] }
 0x264   : > { %v2655_v31 = vpop.eup %1840  ;;  %1852 = vpow2.f32 %v927_v25  ;;  %v1000_v48 = vadd.f32 %v2645_v13, %v999_v24  ;;  %v1096_v6 = vpack.c.bf16 %v2614_v42, %v2609_v41  ;;  %v838_v25 = vsub.f32 %v3004_v4, %v2389_v0  ;;  %v3005_v53 = vld [vmem:[#allocation21_spill] sm:$0xff] }
 0x265   : > { %v2664_v18 = vpop.eup %1842  ;;  %1854 = vpow2.f32 %v931_v59  ;;  %v953_v3 = vmul.f32 1.442695, %v839_v32  ;;  %v1035_v34 = vadd.f32 %v2624_v51, %v1034_v47  ;;  %v2686_v42 = vor.u32 %v1680_v10, %v1644_v7  ;;  %v3008_v7 = vld [vmem:[#allocation30_spill] sm:$0xff] }
 0x266   : > { %v2669_v43 = vpop.eup %1844  ;;  %1856 = vpow2.f32 %v957_v14  ;;  %v1001_v5 = vadd.f32 %v2650_v22, %v1000_v48  ;;  %1130 = vmatpush.bf16.msrb.mxu2 %v1081_v55  ;;  %v840_v14 = vsub.f32 %v3005_v53, %v2389_v0  ;;  %v1094_v9 = vpack.c.bf16 %v2604_v36, %v2599_v30  ;;  %v3007_v36 = vld [vmem:[#allocation27_spill] sm:$0xff] }
 0x267   : > { %v2674_v11 = vpop.eup %1846  ;;  %1858 = vpow2.f32 %v961_v23  ;;  %v1036_v17 = vadd.f32 %v2637_v60, %v1035_v34  ;;  %v846_v10 = vsub.f32 %v3008_v7, %v2389_v0 }
 0x268   : > { %v2681_v61 = vpop.eup %1848  ;;  %1860 = vpow2.f32 %v935_v29  ;;  %v1002_v59 = vadd.f32 %v2655_v31, %v1001_v5  ;;  %v1111_v41 = vpack.c.bf16 %v2674_v11, %v2664_v18  ;;  %v3006_v29 = vld [vmem:[#allocation23_spill] sm:$0xff]  ;;  %v955_v4 = vmul.f32 1.442695, %v840_v14 }
 0x269   : > { %v2688_v44 = vpop.eup %1850  ;;  %1862 = vpow2.f32 %v949_v1  ;;  %1131 = vmatmul.bf16.vlgmr.msrb.gmra.mxu2 %v2686_v42  ;;  %v842_v48 = vsub.f32 %v3006_v29, %v2389_v0  ;;  %v951_v1 = vmul.f32 1.442695, %v838_v25  ;;  %v1092_v25 = vpack.c.bf16 %v2592_v50, %v2561_v27 }
 0x26a   : > { %1151 = vmatpush.bf16.msra.mxu2 %v1096_v6  ;;  %v2691_v62 = vpop.eup %1852  ;;  %1864 = vpow2.f32 %v939_v49  ;;  %v1003_v24 = vadd.f32 %v2669_v43, %v1002_v59  ;;  %1137 = vmatpush.bf16.msrb.mxu3 %v1111_v41  ;;  %v1109_v55 = vpack.c.bf16 %v2688_v44, %v2681_v61  ;;  %v844_v6 = vsub.f32 %v3007_v36, %v2389_v0 }
 0x26b   : > { %v2699_v32 = vpop.eup %1854  ;;  %1866 = vpow2.f32 %v953_v3  ;;  %v1037_v23 = vadd.f32 %v2691_v62, %v1036_v17  ;;  %v959_v17 = vmul.f32 1.442695, %v842_v48  ;;  %v852_v48 = vsub.f32 %v2368_v21, %v2389_v0 }
 0x26c   : > { %v1857_v57 = vpop.eup %1856  ;;  %v1004_v47 = vadd.f32 %v2568_v45, %v1003_v24  ;;  %1868 = vpow2.f32 %v951_v1  ;;  %v963_v27 = vmul.f32 1.442695, %v844_v6  ;;  %v850_v1 = vsub.f32 %v2346_v19, %v2389_v0 }
 0x26d   : > { %v1859_v49 = vpop.eup %1858  ;;  %v1038_v5 = vadd.f32 %v2699_v32, %v1037_v23  ;;  %1870 = vpow2.f32 %v955_v4  ;;  %v1088_v19 = vpack.c.bf16 %v2535_v54, %v2513_v58  ;;  %v1086_v58 = vpack.c.bf16 %v2480_v20, %v2469_v37 }
 0x26e   : > { %1152 = vmatpush.bf16.msra.mxu2 %v1094_v9  ;;  %v2708_v30 = vpop.eup %1860  ;;  %v1005_v3 = vadd.f32 %v2581_v26, %v1004_v47  ;;  %1138 = vmatpush.bf16.msrb.mxu3 %v1109_v55  ;;  %v1107_v24 = vpack.c.bf16 %v1859_v49, %v1857_v57  ;;  %v3009_v9 = vld [vmem:[#allocation33_spill] sm:$0xff]  ;;  %v1090_v47 = vpack.c.bf16 %v2553_v56, %v2546_v46  ;;  %1872 = vpow2.f32 %v959_v17 }
 0x26f   : > { %v1863_v34 = vpop.eup %1862  ;;  %v1039_v59 = vadd.f32 %v2708_v30, %v1038_v5  ;;  %v848_v23 = vsub.f32 %v3009_v9, %v2389_v0  ;;  %v967_v5 = vmul.f32 1.442695, %v846_v10  ;;  %1874 = vpow2.f32 %v963_v27  ;;  %v1646_v9 = vld [vmem:[%s2662_s8 + $0x8] sm:$0xf0] }
 0x270   : > { %v2718_v41 = vpop.eup %1864  ;;  %v1006_v53 = vadd.f32 %v1863_v34, %v1005_v3  ;;  %v975_v56 = vmul.f32 1.442695, %v850_v1  ;;  %v1101_v17 = vpack.c.bf16 %v2669_v43, %v2655_v31  ;;  %v1084_v37 = vpack.c.bf16 %v2457_v33, %v2445_v28 }
 0x271   : > { %v1867_v14 = vpop.eup %1866  ;;  %v1040_v29 = vadd.f32 %v2718_v41, %v1039_v59  ;;  %1876 = vpow2.f32 %v967_v5  ;;  %v1097_v28 = vpack.c.bf16 %v2629_v35, %v2619_v15 }
 0x272   : > { %1153 = vmatpush.bf16.msra.mxu2 %v1092_v25  ;;  %v1007_v50 = vadd.f32 %v1867_v14, %v1006_v53  ;;  %1139 = vmatpush.bf16.msrb.mxu3 %v1107_v24  ;;  %v1105_v3 = vpack.c.bf16 %v1867_v14, %v1863_v34  ;;  %v2731_v4 = vpop.eup %1868  ;;  %v971_v25 = vmul.f32 1.442695, %v848_v23  ;;  %v1679_v14 = vld [vmem:[%s2662_s8 + $0x4] sm:$0xf]  ;;  %s1430_s8 = scalar_lea.hbm %s2923_s6, %s1681_s14 }
 0x273   : > { %v1041_v55 = vadd.f32 %v2574_v52, %v1040_v29  ;;  %v2736_v0 = vpop.eup %1870  ;;  %s1433_s13 = sshll.u32 %s1430_s8, 4  ;;  %s1434_s13 = int_to_ptr.hbm [resolvable:$true] %s1433_s13 }
 0x274   : > { %v1008_v36 = vadd.f32 %v1857_v57, %v1007_v50  ;;  %v979_v57 = vmul.f32 1.442695, %v852_v48  ;;  %v1873_v10 = vpop.eup %1872  ;;  %1878 = vpow2.f32 %v971_v25  ;;  %v1649_v50 = vor.u32 %v1679_v14, %v1646_v9  ;;  %v1215_v9 = vld [vmem:[%s2922_s5 + $0x8] sm:$0xff]  ;;  %s1932_s17 = sshra.s32 %s1434_s13, 4  ;;  %s1933_s17 = int_to_ptr.hbm [resolvable:$true] %s1932_s17 }
 0x275   : > { %v1042_v6 = vadd.f32 %v2587_v8, %v1041_v55  ;;  %1880 = vpow2.f32 %v975_v56  ;;  %v1875_v59 = vpop.eup %1874  ;;  %s1934_s24 = scalar_lea.hbm %s1933_s17, 128  ;;  %p1939_p8 = scmp.lt.s32.totalorder %s1933_s17, %s2923_s6 }
 0x276   : > { %1154 = vmatpush.bf16.msra.mxu2 %v1090_v47  ;;  %v1009_v46 = vadd.f32 %v1859_v49, %v1008_v36  ;;  %1140 = vmatpush.bf16.msrb.mxu3 %v1105_v3  ;;  %1882 = vpow2.f32 %v979_v57  ;;  %v1108_v55 = vpack.c.bf16 %v1875_v59, %v1873_v10  ;;  %p1935_p5 = scmp.ne.s32.totalorder %s1933_s17, %s1934_s24  ;;  %p1940_p10 = scmp.lt.s32.totalorder %s1938_s20, %s1934_s24 }
 0x277   : > { %v1043_v21 = vadd.f32 %v2731_v4, %v1042_v6  ;;  %v1877_v53 = vpop.eup %1876  ;;  %v1106_v6 = vpack.c.bf16 %v2736_v0, %v2731_v4  ;;  %v1100_v4 = vpack.c.bf16 %v2699_v32, %v2691_v62 }
 0x278   : > { %v1010_v34 = vadd.f32 %v2681_v61, %v1009_v46  ;;  %p1936_p6 = pnand %p1935_p5, %p2095_p9  ;;  %p1941_p13 = por %p1940_p10, %p1939_p8 }
 0x279   : > { %v1044_v7 = vadd.f32 %v2736_v0, %v1043_v21  ;;  %v1102_v21 = vpack.c.bf16 %v2718_v41, %v2708_v30  ;;  %v1098_v0 = vpack.c.bf16 %v2637_v60, %v2624_v51  ;;  %v1206_v51 = vld [vmem:[%s2921_s4] sm:$0xff]  ;;  %v1207_v60 = vld [vmem:[%s2921_s4 + $0x8] sm:$0xff] }
 0x27a   : > { %1155 = vmatpush.bf16.msra.mxu2 %v1088_v19  ;;  %v1011_v49 = vadd.f32 %v2688_v44, %v1010_v34  ;;  %1141 = vmatpush.bf16.msrb.mxu3 %v1103_v2  ;;  %v1879_v26 = vpop.eup %1878  ;;  %p1937_p7 = pneg %p1936_p6 }
 0x27b   : > { %v1045_v54 = vadd.f32 %v1873_v10, %v1044_v7  ;;  %v1881_v24 = vpop.eup %1880 }
 0x27c   : > { %v1012_v61 = vadd.f32 %v2664_v18, %v1011_v49  ;;  %v1099_v18 = vpack.c.bf16 %v2650_v22, %v2645_v13  ;;  %v1883_v43 = vpop.eup %1882  ;;  %v3010_v13 = vsub.f32 %v2374_v16, %v2378_v63  ;;  %v981_v16 = vld [vmem:[#allocation3] sm:$0x3]  ;;  %p1942_p0 = pnand %p1941_p13, %p1937_p7 }
 0x27d   : > { %v1046_v44 = vadd.f32 %v1875_v59, %v1045_v54  ;;  %v1112_v27 = vpack.c.bf16 %v1883_v43, %v1881_v24 }
 0x27e   : > { %1156 = vmatpush.bf16.msra.mxu2 %v1086_v58  ;;  %v1013_v45 = vadd.f32 %v2674_v11, %v1012_v61  ;;  %1142 = vmatpush.bf16.msrb.mxu3 %v1101_v17  ;;  %v1082_v11 = vpack.c.bf16 %v2433_v40, %v2423_v39  ;;  %v782_v22 = vmul.f32 1.442695, %v3010_v13  ;;  %v1110_v40 = vpack.c.bf16 %v1879_v26, %v1877_v53  ;;  %v1208_v17 = vld [vmem:[%s2921_s4 + $0x10] sm:$0xff]  ;;  %v1221_v13 = vld [vmem:[%s2922_s5 + $0x38] sm:$0xff] }
 0x27f   : > { %v1047_v20 = vadd.f32 %v1877_v53, %v1046_v44  ;;  %v2006_v44 = vmov 0   ;;  %v1214_v53 = vld [vmem:[%s2922_s5] sm:$0xff] }
 0x280   : > { %v1014_v2 = vrot.slane %v1013_v45, 4  ;;  %1884 = vpow2.f32 %v782_v22  ;;  %1753 = vset.pattern.permute.xlu0 %v2006_v44  ;;  %1754 = vset.pattern.permute.xlu1 %v2006_v44  ;;  %v1213_v22 = vld [vmem:[%s2921_s4 + $0x38] sm:$0xff] }
 0x281   : > { %v1048_v31 = vadd.f32 %v1879_v26, %v1047_v20  ;;  %1224 = vperm.xlu0 %1753, %v1214_v53   ;;  %1755 = vset.pattern.permute.xlu2 %v2006_v44  ;;  %v1373_v44 = vld [vmem:[%s2124_s7 + $0x28] sm:$0xff] }
 0x282   : > { %1157 = vmatpush.bf16.msra.mxu2 %v1084_v37  ;;  %1143 = vmatpush.bf16.msrb.mxu3 %v1099_v18  ;;  %v1015_v23 = vadd.f32 %v1014_v2, %v1013_v45 }
 0x283   : > { %v1049_v29 = vadd.f32 %v1881_v24, %v1048_v31  ;;  %v1209_v24 = vld [vmem:[%s2921_s4 + $0x18] sm:$0xff]  ;;  %1229 = vperm.xlu1 %1754, %v1215_v9  }
 0x284   : > { %v1016_v47 = vrot.slane %v1015_v23, 2 }
 0x285   : > { %v1050_v33 = vadd.f32 %v1883_v43, %v1049_v29  ;;  %v1210_v29 = vld [vmem:[%s2921_s4 + $0x20] sm:$0xff] }
 0x286   : > { %1158 = vmatpush.bf16.msra.mxu2 %v1082_v11  ;;  %1144 = vmatpush.bf16.msrb.mxu3 %v1097_v28  ;;  %v1017_v48 = vadd.f32 %v1016_v47, %v1015_v23  ;;  %v1885_v3 = vpop.eup %1884  ;;  %v1216_v28 = vld [vmem:[%s2922_s5 + $0x10] sm:$0xff]  ;;  %v1217_v47 = vld [vmem:[%s2922_s5 + $0x18] sm:$0xff] }
 0x287   : > { %v1051_v1 = vrot.slane %v1050_v33, 4  ;;  %v982_v46 = vmul.f32 %v1885_v3, %v981_v16  ;;  %v1073_v8 = vperm.slane %v1885_v3, 0  ;;  %v1074_v45 = vperm.slane %v1885_v3, 1  ;;  %1239 = vperm.xlu2 %1755, %v1217_v47   ;;  %v1370_v3 = vld [vmem:[%s2124_s7 + $0x10] sm:$0xff]  ;;  %v1379_v47 = vld [vmem:[%s2124_s7 + $0x58] sm:$0xff] }
 0x288   : > { %v1018_v5 = vrot.slane %v1017_v48, 1 }
 0x289   : > { %1159 = vmatmul.bf16.vlgmr.msra.gmra.mxu2 %v2686_v42  ;;  %v1052_v39 = vadd.f32 %v1051_v1, %v1050_v33  ;;  %1145 = vmatmul.bf16.vlgmr.msrb.gmra.mxu3 %v1649_v50  ;;  %v1077_v30 = vmul.f32 0.0, %v1073_v8  ;;  %v1078_v2 = vmul.f32 0.0, %v1074_v45  ;;  %v1211_v33 = vld [vmem:[%s2921_s4 + $0x28] sm:$0xff]  ;;  %v1218_v1 = vld [vmem:[%s2922_s5 + $0x20] sm:$0xff] }
 0x28a   : > { %1165 = vmatpush.bf16.msra.mxu3 %v1112_v27  ;;  %v1019_v25 = vadd.f32 %v1018_v5, %v1017_v48  ;;  %v1219_v27 = vld [vmem:[%s2922_s5 + $0x28] sm:$0xff] }
 0x28b   : > { %v1053_v15 = vrot.slane %v1052_v39, 2  ;;  %1234 = vperm.xlu1 %1754, %v1216_v28  }
 0x28d   : > { %v1054_v35 = vadd.f32 %v1053_v15, %v1052_v39  ;;  %v1220_v39 = vld [vmem:[%s2922_s5 + $0x30] sm:$0xff]  ;;  %v1368_v15 = vld [vmem:[%s2124_s7] sm:$0xff] }
 0x28e   : > { %1166 = vmatpush.bf16.msra.mxu3 %v1110_v40 }
 0x28f   : > { %v1055_v36 = vrot.slane %v1054_v35, 1  ;;  %1244 = vperm.xlu2 %1755, %v1218_v1  }
 0x291   : > { %v1056_v63 = vadd.f32 %v1055_v36, %v1054_v35 }
 0x292   : > { %1167 = vmatpush.bf16.msra.mxu3 %v1108_v55 }
 0x293   : > { %v1059_v42 = vrot.slane %v1056_v63, 7  ;;  %1249 = vperm.xlu1 %1754, %v1219_v27   ;;  %v1377_v27 = vld [vmem:[%s2124_s7 + $0x48] sm:$0xff] }
 0x295   : > { %v1060_v19 = vsel %vm777_vm2, %v1019_v25, %v1059_v42  ;;  %v1372_v42 = vld [vmem:[%s2124_s7 + $0x20] sm:$0xff] }
 0x296   : > { %1168 = vmatpush.bf16.msra.mxu3 %v1106_v6  ;;  %v1062_v56 = vadd.f32 %v1060_v19, %v982_v46 }
 0x297   : > { %1254 = vperm.xlu2 %1755, %v1220_v39  }
 0x298   : > { %1067 = vst.msk [vmem:[#allocation3] sm:$0x3] %vm2310_vm1, %v1062_v56 }
 0x29a   : > { %1169 = vmatpush.bf16.msra.mxu3 %v1104_v38 }
 0x29b   : > { %1259 = vperm.xlu1 %1754, %v1221_v13  }
 0x29e   : > { %1170 = vmatpush.bf16.msra.mxu3 %v1102_v21 }
 0x29f   : > { %v1195_v34 = vld [vmem:[#allocation3] sm:$0x3] }
 0x2a0   : > { %1886 = vrcp.f32 %v1195_v34 }
 0x2a2   : > { %1171 = vmatpush.bf16.msra.mxu3 %v1100_v4  ;;  %v1374_v4 = vld [vmem:[%s2124_s7 + $0x30] sm:$0xff] }
 0x2a6   : > { %1172 = vmatpush.bf16.msra.mxu3 %v1098_v0  ;;  %v1887_v7 = vpop.eup %1886 }
 0x2a7   : > { %v1198_v62 = vperm.slane %v1887_v7, 0  ;;  %v1199_v14 = vperm.slane %v1887_v7, 1 }
 0x2a9   : > { %1173 = vmatmul.bf16.vlgmr.msra.gmra.mxu3 %v1649_v50  ;;  %v1212_v50 = vld [vmem:[%s2921_s4 + $0x30] sm:$0xff] }
 0x2e1   : > { %v1240_v56 = vpop.permute.xlu2 %1239 }
 0x2ec   : > { %v1132_v57 = vpop.f32.mrf.mxu2 }
 0x2f3   : > { %v1225_v40 = vpop.permute.xlu0 %1224 }
 0x2f4   : > { %v1134_v12 = vpop.f32.mrf.mxu2 }
 0x2f5   : > { %v1230_v5 = vpop.permute.xlu1 %1229 }
 0x2fd   : > { %v1235_v6 = vpop.permute.xlu1 %1234 }
 0x30c   : > { %v1146_v52 = vpop.f32.mrf.mxu3  ;;  %v1160_v59 = vpop.f32.mrf.mxu2 }
 0x30d   : > { %v1147_v38 = vadd.f32 %v1146_v52, %v1132_v57  ;;  %v1369_v52 = vld [vmem:[%s2124_s7 + $0x8] sm:$0xff] }
 0x30f   : > { %v1179_v49 = vadd.f32 %v1147_v38, %v1077_v30 }
 0x311   : > { %v1202_v54 = vmul.f32 %v1198_v62, %v1179_v49 }
 0x314   : > { %v1148_v10 = vpop.f32.mrf.mxu3  ;;  %v1162_v37 = vpop.f32.mrf.mxu2 }
 0x315   : > { %v1149_v41 = vadd.f32 %v1148_v10, %v1134_v12  ;;  %v1245_v12 = vpop.permute.xlu2 %1244  ;;  %v1376_v10 = vld [vmem:[%s2124_s7 + $0x40] sm:$0xff] }
 0x317   : > { %v1181_v58 = vadd.f32 %v1149_v41, %v1077_v30 }
 0x319   : > { %v1204_v32 = vmul.f32 %v1198_v62, %v1181_v58  ;;  %v1371_v58 = vld [vmem:[%s2124_s7 + $0x18] sm:$0xff] }
 0x31b   : > { %1300 = vmatpush.msrb.mxu2 %v1204_v32 }
 0x31d   : > { %1301 = vmatpush.msrb.mxu2 %v1202_v54  ;;  %v1255_v45 = vpop.permute.xlu2 %1254 }
 0x31e   : > { %1650 = vmatmul.msk.f32.vlgmr.msrb.gmra.mxu2 %vm472_vm0, %v1206_v51 }
 0x326   : > { %1651 = vmatmul.msk.f32.gmra.mxu2 %vm472_vm0, %v1207_v60 }
 0x32c   : > { %v1174_v61 = vpop.f32.mrf.mxu3 }
 0x32d   : > { %v1175_v20 = vadd.f32 %v1174_v61, %v1160_v59 }
 0x32e   : > { %1652 = vmatmul.msk.f32.gmra.mxu2 %vm472_vm0, %v1208_v17 }
 0x32f   : > { %v1180_v31 = vadd.f32 %v1175_v20, %v1078_v2 }
 0x331   : > { %v1203_v23 = vmul.f32 %v1199_v14, %v1180_v31  ;;  %v1375_v31 = vld [vmem:[%s2124_s7 + $0x38] sm:$0xff] }
 0x334   : > { %v1176_v26 = vpop.f32.mrf.mxu3 }
 0x335   : > { %v1177_v18 = vadd.f32 %v1176_v26, %v1162_v37  ;;  %v1380_v26 = vld [vmem:[%s2124_s7 + $0x60] sm:$0xff] }
 0x336   : > { %1653 = vmatmul.msk.f32.gmra.mxu2 %vm472_vm0, %v1209_v24 }
 0x337   : > { %v1182_v43 = vadd.f32 %v1177_v18, %v1078_v2 }
 0x339   : > { %v1205_v11 = vmul.f32 %v1199_v14, %v1182_v43 }
 0x33b   : > { %1341 = vmatpush.msrb.mxu3 %v1205_v11 }
 0x33d   : > { %1342 = vmatpush.msrb.mxu3 %v1203_v23  ;;  %v1382_v23 = vld [vmem:[%s2124_s7 + $0x70] sm:$0xff] }
 0x33e   : > { %1658 = vmatmul.msk.f32.vlgmr.msrb.gmra.mxu3 %vm472_vm0, %v1206_v51  ;;  %1654 = vmatmul.msk.f32.gmra.mxu2 %vm472_vm0, %v1210_v29  ;;  %v1378_v51 = vld [vmem:[%s2124_s7 + $0x50] sm:$0xff] }
 0x346   : > { %1659 = vmatmul.msk.f32.gmra.mxu3 %vm472_vm0, %v1207_v60  ;;  %1655 = vmatmul.msk.f32.gmra.mxu2 %vm472_vm0, %v1211_v33  ;;  %v1250_v60 = vpop.permute.xlu1 %1249 }
 0x34e   : > { %1660 = vmatmul.msk.f32.gmra.mxu3 %vm472_vm0, %v1208_v17  ;;  %1656 = vmatmul.msk.f32.gmra.mxu2 %vm472_vm0, %v1212_v50  ;;  %v1260_v14 = vpop.permute.xlu1 %1259 }
 0x356   : > { %1661 = vmatmul.msk.f32.gmra.mxu3 %vm472_vm0, %v1209_v24  ;;  %1657 = vmatmul.msk.f32.gmra.mxu2 %vm472_vm0, %v1213_v22 }
 0x35e   : > { %1662 = vmatmul.msk.f32.gmra.mxu3 %vm472_vm0, %v1210_v29 }
 0x366   : > { %1663 = vmatmul.msk.f32.gmra.mxu3 %vm472_vm0, %v1211_v33 }
 0x36e   : > { %1664 = vmatmul.msk.f32.gmra.mxu3 %vm472_vm0, %v1212_v50 }
 0x376   : > { %1665 = vmatmul.msk.f32.gmra.mxu3 %vm472_vm0, %v1213_v22 }
 0x3a1   : > { %v1303_v48 = vpop.f32.mrf.mxu2 }
 0x3a2   : > { %v1304_v35 = vadd.f32 %v1303_v48, %v1225_v40  ;;  %v1381_v48 = vld [vmem:[%s2124_s7 + $0x68] sm:$0xff] }
 0x3a4   : > { %v1384_v55 = vadd.f32 %v1368_v15, %v1304_v35 }
 0x3a6   : > { %1400 = vst [vmem:[%s2845_s28] sm:$0xff] %v1384_v55 }
 0x3a9   : > { %v1306_v36 = vpop.f32.mrf.mxu2 }
 0x3aa   : > { %v1307_v16 = vadd.f32 %v1306_v36, %v1230_v5 }
 0x3ac   : > { %v1386_v63 = vadd.f32 %v1370_v3, %v1307_v16 }
 0x3ae   : > { %1402 = vst [vmem:[%s2845_s28 + $0x10] sm:$0xff] %v1386_v63 }
 0x3b1   : > { %v1309_v25 = vpop.f32.mrf.mxu2 }
 0x3b2   : > { %v1310_v46 = vadd.f32 %v1309_v25, %v1235_v6 }
 0x3b4   : > { %v1388_v19 = vadd.f32 %v1372_v42, %v1310_v46 }
 0x3b6   : > { %1404 = vst [vmem:[%s2845_s28 + $0x20] sm:$0xff] %v1388_v19 }
 0x3b9   : > { %v1312_v21 = vpop.f32.mrf.mxu2 }
 0x3ba   : > { %v1313_v0 = vadd.f32 %v1312_v21, %v1240_v56 }
 0x3bc   : > { %v1390_v57 = vadd.f32 %v1374_v4, %v1313_v0 }
 0x3be   : > { %1406 = vst [vmem:[%s2845_s28 + $0x30] sm:$0xff] %v1390_v57 }
 0x3c1   : > { %v1344_v34 = vpop.f32.mrf.mxu3  ;;  %v1315_v7 = vpop.f32.mrf.mxu2 }
 0x3c2   : > { %v1345_v8 = vadd.f32 %v1344_v34, %v1225_v40  ;;  %v1316_v30 = vadd.f32 %v1315_v7, %v1245_v12 }
 0x3c4   : > { %v1385_v38 = vadd.f32 %v1369_v52, %v1345_v8  ;;  %v1392_v41 = vadd.f32 %v1376_v10, %v1316_v30 }
 0x3c6   : > { %1401 = vst [vmem:[%s2845_s28 + $0x8] sm:$0xff] %v1385_v38 }
 0x3c7   : > { %1408 = vst [vmem:[%s2845_s28 + $0x40] sm:$0xff] %v1392_v41 }
 0x3c9   : > { %v1347_v49 = vpop.f32.mrf.mxu3  ;;  %v1318_v54 = vpop.f32.mrf.mxu2 }
 0x3ca   : > { %v1348_v62 = vadd.f32 %v1347_v49, %v1230_v5  ;;  %v1319_v59 = vadd.f32 %v1318_v54, %v1250_v60  ;;  %v1383_v5 = vld [vmem:[%s2124_s7 + $0x78] sm:$0xff] }
 0x3cc   : > { %v1387_v32 = vadd.f32 %v1371_v58, %v1348_v62  ;;  %v1394_v61 = vadd.f32 %v1378_v51, %v1319_v59 }
 0x3ce   : > { %1403 = vst [vmem:[%s2845_s28 + $0x18] sm:$0xff] %v1387_v32 }
 0x3cf   : > { %1410 = vst [vmem:[%s2845_s28 + $0x50] sm:$0xff] %v1394_v61 }
 0x3d1   : > { %v1350_v17 = vpop.f32.mrf.mxu3  ;;  %v1321_v20 = vpop.f32.mrf.mxu2 }
 0x3d2   : > { %v1351_v53 = vadd.f32 %v1350_v17, %v1235_v6  ;;  %v1322_v2 = vadd.f32 %v1321_v20, %v1255_v45 }
 0x3d4   : > { %v1389_v37 = vadd.f32 %v1373_v44, %v1351_v53  ;;  %v1396_v18 = vadd.f32 %v1380_v26, %v1322_v2 }
 0x3d6   : > { %1405 = vst [vmem:[%s2845_s28 + $0x28] sm:$0xff] %v1389_v37 }
 0x3d7   : > { %1412 = vst [vmem:[%s2845_s28 + $0x60] sm:$0xff] %v1396_v18 }
 0x3d9   : > { %v1353_v24 = vpop.f32.mrf.mxu3  ;;  %v1324_v11 = vpop.f32.mrf.mxu2 }
 0x3da   : > { %v1354_v43 = vadd.f32 %v1353_v24, %v1240_v56  ;;  %v1325_v29 = vadd.f32 %v1324_v11, %v1260_v14 }
 0x3dc   : > { %v1391_v9 = vadd.f32 %v1375_v31, %v1354_v43  ;;  %v1398_v28 = vadd.f32 %v1382_v23, %v1325_v29 }
 0x3de   : > { %1407 = vst [vmem:[%s2845_s28 + $0x38] sm:$0xff] %v1391_v9 }
 0x3df   : > { %1414 = vst [vmem:[%s2845_s28 + $0x70] sm:$0xff] %v1398_v28 }
 0x3e1   : > { %v1356_v33 = vpop.f32.mrf.mxu3 }
 0x3e2   : > { %v1357_v50 = vadd.f32 %v1356_v33, %v1245_v12 }
 0x3e4   : > { %v1393_v13 = vadd.f32 %v1377_v27, %v1357_v50 }
 0x3e6   : > { %1409 = vst [vmem:[%s2845_s28 + $0x48] sm:$0xff] %v1393_v13 }
 0x3e9   : > { %v1359_v22 = vpop.f32.mrf.mxu3 }
 0x3ea   : > { %v1360_v1 = vadd.f32 %v1359_v22, %v1250_v60 }
 0x3ec   : > { %v1395_v39 = vadd.f32 %v1379_v47, %v1360_v1 }
 0x3ee   : > { %1411 = vst [vmem:[%s2845_s28 + $0x58] sm:$0xff] %v1395_v39 }
 0x3f1   : > { %v1362_v40 = vpop.f32.mrf.mxu3 }
 0x3f2   : > { %v1363_v15 = vadd.f32 %v1362_v40, %v1255_v45 }
 0x3f4   : > { %v1397_v35 = vadd.f32 %v1381_v48, %v1363_v15 }
 0x3f6   : > { %1413 = vst [vmem:[%s2845_s28 + $0x68] sm:$0xff] %v1397_v35 }
 0x3f9   : > { %v1365_v55 = vpop.f32.mrf.mxu3 }
 0x3fa   : > { %v1366_v36 = vadd.f32 %v1365_v55, %v1260_v14 }
 0x3fc   : > { %v1399_v3 = vadd.f32 %v1383_v5, %v1366_v36 }
 0x3fe   : > { %1415 = vst [vmem:[%s2845_s28 + $0x78] sm:$0xff] %v1399_v3 }
 0x3ff   : > { %1945 = shalt.err (!%p1942_p0)
}
 0x400   : > { %s2007_s29 = smov 256   ;;  %s2008_s7 = smov 16  }
 0x401   : > { %1686 = dma.vmem_to_hbm [thread:$0]  (%p2095_p9), %s1432_s15, 2048, %s1434_s13, %s1417_s16, %s2007_s29, %s2007_s29, %s2008_s7  }
 0x402 PF: > { %s1448_s28 = sand.u32 1, %s1980_s21   ;;  %p1693_p1 = pnand %p1581_p12, %p2102_p11 }
 0x403   : > { %s1449_s9 = scalar_lea.sflag [#allocation7], %s1448_s28 }
 0x404   : > { %p1694_p2 = pneg %p1693_p1 }
 0x406   : > { %1975 = dma.done.wait (%p1694_p2), %s1449_s9, 2048  }
 0x407   : > { %1977 = vsyncadd (%p1694_p2), %s1449_s9, 4294965248  ;;  %s22_s26 = sadd.s32 1, %s2000_s26   ;;  %s3011_s10 = sld [smem:[#allocation11_spill]] }
 0x408   : > { %p19_p3 = scmp.ge.s32.totalorder %s22_s26, 4   ;;  %s3012_s21 = smov %s1984_s22 }
 0x409   : > { %s3013_s22 = smov %s1988_s23  ;;  %s3014_s23 = smov %s2100_s11 }
 0x40a   : > { %s3015_s24 = smov %s1996_s25  ;;  %21 = sbr.rel (!%p19_p3) target bundleno = 6 (0x6), region = 106 }
 0x40d   : > { %s3016_s25 = smov %s3011_s10 }
 0x40f   :  { %1455 = vsyncpa [#allocation6], 1 }
 0x410   :  { %1457 = vsyncpa [#allocation6 + $0x1], 1 }
 0x411   :  { %1458 = vsyncpa [#allocation7], 1 }
 0x412   :  { %1460 = vsyncpa [#allocation7 + $0x1], 1 }

</bundles_post_ra>
